<compile_context>
chip_gen: v7x
topology: tpu7x:2x2x1
jax: 0.10.0
libtpu: 0.0.40
codegen_flags: <defaults>
</compile_context>

<pallas_src>
import jax
import jax.numpy as jnp
from jax import lax
from jax.experimental import pallas as pl
from jax.experimental.pallas import tpu as pltpu

EPS = 1e-5
PAD_ROWS = 8  # sublane tail padding on the activation scratch buffers


def _conv_out_len(l, k, s):
    return (l - k) // s + 1


def _round_up(x, m):
    return ((x + m - 1) // m) * m


def init_params(key, seq_len=90, in_ch=6, hidden_ch=20, out_ch=6):
    """Deterministic synthetic parameters with the exact shapes of ActivityCNN2D.__init__."""
    stride1 = seq_len // 31
    k1 = stride1
    l1 = _conv_out_len(seq_len, k1, stride1)
    l2 = _conv_out_len(l1, 3, 2)
    l3 = _conv_out_len(l2, 3, 2)
    l4 = _conv_out_len(l3, 3, 2)

    keys = iter(jax.random.split(key, 64))

    def bn_params(c):
        return dict(
            gamma=jax.random.uniform(next(keys), (c,), jnp.float32, 0.5, 1.5),
            beta=0.1 * jax.random.normal(next(keys), (c,), jnp.float32),
            mean=0.1 * jax.random.normal(next(keys), (c,), jnp.float32),
            var=jax.random.uniform(next(keys), (c,), jnp.float32, 0.5, 1.5),
        )

    def conv_params(cin, cout, k):
        fan_in = cin * k
        w = jax.random.normal(next(keys), (cout, cin, 1, k), jnp.float32) / jnp.sqrt(fan_in)
        b = 0.05 * jax.random.normal(next(keys), (cout,), jnp.float32)
        return w, b

    p = {}
    p["bn0"] = bn_params(in_ch)
    p["w1"], p["b1"] = conv_params(in_ch, hidden_ch, k1)
    p["bn1"] = bn_params(hidden_ch)
    p["w2"], p["b2"] = conv_params(hidden_ch, hidden_ch, 3)
    p["bn2"] = bn_params(hidden_ch)
    p["w3"], p["b3"] = conv_params(hidden_ch, hidden_ch, 3)
    p["bn3"] = bn_params(hidden_ch)
    p["w4"], p["b4"] = conv_params(hidden_ch, hidden_ch, 3)
    p["bn4"] = bn_params(hidden_ch * l4)
    fan_in = hidden_ch * l4
    p["dense_w"] = jax.random.normal(next(keys), (out_ch, fan_in), jnp.float32) / jnp.sqrt(fan_in)
    p["dense_b"] = 0.05 * jax.random.normal(next(keys), (out_ch,), jnp.float32)

    dims = dict(seq_len=seq_len, in_ch=in_ch, hidden_ch=hidden_ch, out_ch=out_ch,
                stride1=stride1, k1=k1, l1=l1, l2=l2, l3=l3, l4=l4)
    return p, dims


def _bn_scale_shift(bn):
    scale = bn["gamma"] / jnp.sqrt(bn["var"] + EPS)
    shift = bn["beta"] - bn["mean"] * scale
    return scale, shift


def _fold_conv(w, b, sc_in, sh_in):
    """Fold a preceding per-channel BN affine into a (Cout, Cin, 1, k) conv.

    Returns tap weights of shape (k, Cin, Cout) and the folded bias (Cout,)."""
    w3 = jnp.transpose(w[:, :, 0, :], (2, 1, 0))          # (k, Cin, Cout)
    wf = w3 * sc_in[None, :, None]                        # scale on the input-channel axis
    bf = b + jnp.einsum("kio,i->o", w3, sh_in)            # shift contribution to bias
    return wf, bf


def make_forward(params, dims, batch):
    seq_len, in_ch = dims["seq_len"], dims["in_ch"]
    hid, out_ch = dims["hidden_ch"], dims["out_ch"]
    s1, k1 = dims["stride1"], dims["k1"]
    L1, L2, L3, L4 = dims["l1"], dims["l2"], dims["l3"], dims["l4"]

    # Per-batch activation pitches.  Chosen so each stride-2 tap of the flat
    # (batch*pitch, C) activation slab yields, per batch element, a contiguous block
    # of pitch/2 output rows (the first L_out of which are valid).  P1 divisible by 8
    # keeps every later pitch even and every batch block sublane-aligned.
    P1 = _round_up(max(L1, 2 * L2, 4 * L3, 8 * L4), 8)
    P2, P3, P4 = P1 // 2, P1 // 4, P1 // 8
    assert P1 >= L1 and P2 >= L2 and P3 >= L3 and P4 >= L4

    # ---- glue: fold every BatchNorm affine into the next linear layer ----
    sc0, sh0 = _bn_scale_shift(params["bn0"])
    sc1, sh1 = _bn_scale_shift(params["bn1"])
    sc2, sh2 = _bn_scale_shift(params["bn2"])
    sc3, sh3 = _bn_scale_shift(params["bn3"])
    sc4, sh4 = _bn_scale_shift(params["bn4"])

    w1t, b1f = _fold_conv(params["w1"], params["b1"], sc0, sh0)   # (k1, in_ch, hid)
    w2f, b2f = _fold_conv(params["w2"], params["b2"], sc1, sh1)   # (3, hid, hid)
    w3f, b3f = _fold_conv(params["w3"], params["b3"], sc2, sh2)
    w4f, b4f = _fold_conv(params["w4"], params["b4"], sc3, sh3)
    w1f = w1t.reshape(k1 * in_ch, hid)                            # im2col weight: row j*in_ch + ci
    bhid = jnp.stack([b1f, b2f, b3f, b4f], axis=0)                # (4, hid) packed biases

    # PyTorch Flatten of (N, hid, 1, L4) gives feature f = c*L4 + l (channel-major).
    # The kernel's conv4 output row (n, l) holds channels c, so re-lay bn4/dense to
    # [l, c] order and fold bn4 into the dense weight/bias.
    dw4 = params["dense_w"].reshape(out_ch, hid, L4)              # [o, c, l]
    sc4_m = sc4.reshape(hid, L4)                                  # [c, l]
    dw = jnp.transpose(dw4 * sc4_m[None, :, :], (2, 1, 0))        # (L4, hid, out_ch)
    db = (params["dense_b"] + params["dense_w"] @ sh4).reshape(1, out_ch)

    param_arrays = [w1f, w2f, w3f, w4f, bhid, dw, db]

    BP1, BP2, BP3, BP4 = batch * P1, batch * P2, batch * P3, batch * P4

    # ---- the fused Pallas kernel: whole batch, single grid step ----
    def kernel(xc_ref, w1_ref, w2_ref, w3_ref, w4_ref, bhid_ref, dw_ref, db_ref,
               out_ref, a1, a2, a3, a4):
        zeros_tail = jnp.zeros((PAD_ROWS, hid), jnp.float32)

        # conv1 + relu (bn0 folded; input arrives im2col'ed as (B*P1, k1*in_ch)):
        # single matmul with M = batch*P1.
        h = jnp.dot(xc_ref[...], w1_ref[...], preferred_element_type=jnp.float32)
        a1[:BP1, :] = jnp.maximum(h + bhid_ref[0:1, :], 0.0)
        a1[BP1:, :] = zeros_tail   # deterministic tail for the j=2 tap read below

        # conv2 (k=3, stride 2) + relu (bn1 folded).  Each tap is one flat strided
        # sublane read covering all batch elements (pitch P1 -> pitch P2).
        acc = jnp.dot(a1[pl.ds(0, BP2, stride=2), :], w2_ref[0],
                      preferred_element_type=jnp.float32)
        for j in range(1, 3):
            acc = acc + jnp.dot(a1[pl.ds(j, BP2, stride=2), :], w2_ref[j],
                                preferred_element_type=jnp.float32)
        a2[:BP2, :] = jnp.maximum(acc + bhid_ref[1:2, :], 0.0)
        a2[BP2:, :] = zeros_tail

        # conv3 (k=3, stride 2) + relu (bn2 folded).
        acc = jnp.dot(a2[pl.ds(0, BP3, stride=2), :], w3_ref[0],
                      preferred_element_type=jnp.float32)
        for j in range(1, 3):
            acc = acc + jnp.dot(a2[pl.ds(j, BP3, stride=2), :], w3_ref[j],
                                preferred_element_type=jnp.float32)
        a3[:BP3, :] = jnp.maximum(acc + bhid_ref[2:3, :], 0.0)
        a3[BP3:, :] = zeros_tail

        # conv4 (k=3, stride 2) + relu (bn3 folded).
        acc = jnp.dot(a3[pl.ds(0, BP4, stride=2), :], w4_ref[0],
                      preferred_element_type=jnp.float32)
        for j in range(1, 3):
            acc = acc + jnp.dot(a3[pl.ds(j, BP4, stride=2), :], w4_ref[j],
                                preferred_element_type=jnp.float32)
        a4[...] = jnp.maximum(acc + bhid_ref[3:4, :], 0.0)        # (B*P4, hid)

        # flatten + bn4 + dense (bn4 folded into dw/db).  Rows {n*P4 + l : l < L4} of
        # a4 are the valid conv4 outputs; each position l contributes one batch-wide
        # (B, hid) @ (hid, out_ch) dot.
        res = jnp.dot(a4[pl.ds(0, batch, stride=P4), :], dw_ref[0],
                      preferred_element_type=jnp.float32)
        for l in range(1, L4):
            res = res + jnp.dot(a4[pl.ds(l, batch, stride=P4), :], dw_ref[l],
                                preferred_element_type=jnp.float32)
        out_ref[...] = res + db_ref[...]

    def full_spec(a):
        return pl.BlockSpec(a.shape, lambda i, _nd=a.ndim: (0,) * _nd)

    in_specs = ([pl.BlockSpec((BP1, k1 * in_ch), lambda i: (0, 0))]
                + [full_spec(a) for a in param_arrays])
    out_spec = pl.BlockSpec((batch, out_ch), lambda i: (0, 0))

    fwd = pl.pallas_call(
        kernel,
        out_shape=jax.ShapeDtypeStruct((batch, out_ch), jnp.float32),
        grid=(1,),
        in_specs=in_specs,
        out_specs=out_spec,
        scratch_shapes=[
            pltpu.VMEM((BP1 + PAD_ROWS, hid), jnp.float32),
            pltpu.VMEM((BP2 + PAD_ROWS, hid), jnp.float32),
            pltpu.VMEM((BP3 + PAD_ROWS, hid), jnp.float32),
            pltpu.VMEM((BP4, hid), jnp.float32),
        ],
        compiler_params=pltpu.CompilerParams(dimension_semantics=("arbitrary",)),
    )

    @jax.jit
    def forward(x_nchw):
        # PyTorch layout (N, in_ch, 1, seq_len) -> (N, seq, in_ch).
        x_nlc = jnp.transpose(x_nchw[:, :, 0, :], (0, 2, 1))
        if k1 == s1:
            # kernel_size == stride (always true for ActivityCNN2D): conv1 taps are
            # non-overlapping, so the im2col is a PURE RESHAPE of the (zero-padded /
            # truncated) sequence -- no gather, no concat.  Rows l >= L1 per batch are
            # junk and never reach the output.
            need = s1 * P1
            pad = max(0, need - seq_len)
            xp = jnp.pad(x_nlc, ((0, 0), (0, pad), (0, 0)))[:, :need, :]
            x_col = xp.reshape(BP1, k1 * in_ch)
        else:
            # generic fallback (overlapping taps): strided slices + lane concat.
            need = s1 * (P1 - 1) + k1
            pad = max(0, need - seq_len)
            xp = jnp.pad(x_nlc, ((0, 0), (0, pad), (0, 0)))[:, :need, :]
            cols = [xp[:, j:j + s1 * (P1 - 1) + 1:s1, :] for j in range(k1)]
            x_col = jnp.concatenate(cols, axis=2).reshape(BP1, k1 * in_ch)
        return fwd(x_col, *param_arrays)

    return forward


def ref_forward(x, p, dims):
    """Pure-JAX reference mirroring the PyTorch module (NCHW, eval-mode BN)."""
    def bn4d(y, bn):
        sc = bn["gamma"] / jnp.sqrt(bn["var"] + EPS)
        sh = bn["beta"] - bn["mean"] * sc
        return y * sc[None, :, None, None] + sh[None, :, None, None]

    def conv(y, w, b, stride):
        out = lax.conv_general_dilated(
            y, w, window_strides=(1, stride), padding="VALID",
            dimension_numbers=("NCHW", "OIHW", "NCHW"),
            precision=lax.Precision.HIGHEST)
        return out + b[None, :, None, None]

    y = bn4d(x, p["bn0"])
    y = jnp.maximum(conv(y, p["w1"], p["b1"], dims["stride1"]), 0.0)
    y = bn4d(y, p["bn1"])
    y = jnp.maximum(conv(y, p["w2"], p["b2"], 2), 0.0)
    y = bn4d(y, p["bn2"])
    y = jnp.maximum(conv(y, p["w3"], p["b3"], 2), 0.0)
    y = bn4d(y, p["bn3"])
    y = jnp.maximum(conv(y, p["w4"], p["b4"], 2), 0.0)
    y = y.reshape(y.shape[0], -1)  # channel-major flatten, same as torch.nn.Flatten
    sc = p["bn4"]["gamma"] / jnp.sqrt(p["bn4"]["var"] + EPS)
    sh = p["bn4"]["beta"] - p["bn4"]["mean"] * sc
    y = y * sc[None, :] + sh[None, :]
    return jnp.dot(y, p["dense_w"].T, precision=lax.Precision.HIGHEST) + p["dense_b"][None, :]


if __name__ == "__main__":
    key = jax.random.PRNGKey(0)
    pkey, xkey = jax.random.split(key)

    seq_len, in_ch, hidden_ch, out_ch, batch = 90, 6, 20, 6, 4
    params, dims = init_params(pkey, seq_len, in_ch, hidden_ch, out_ch)

    # PyTorch-style NCHW input with H == 1: (N, in_ch, 1, seq_len)
    x = jax.random.normal(xkey, (batch, in_ch, 1, seq_len), jnp.float32)

    forward = make_forward(params, dims, batch)
    out = jax.block_until_ready(forward(x))
    ref = jax.block_until_ready(ref_forward(x, params, dims))

    assert out.shape == (batch, out_ch)
    err = float(jnp.max(jnp.abs(out - ref)))
    assert jnp.allclose(out, ref, rtol=1e-2, atol=1e-2), err
    print("KERNEL_OK")
</pallas_src>

<mosaic_0001>
module attributes {stable_mosaic.version = 11 : i64} {
  func.func @kernel(%arg0: i32, %arg1: memref<192x12xf32, #tpu.memory_space<vmem>>, %arg2: memref<12x20xf32, #tpu.memory_space<vmem>>, %arg3: memref<3x20x20xf32, #tpu.memory_space<vmem>>, %arg4: memref<3x20x20xf32, #tpu.memory_space<vmem>>, %arg5: memref<3x20x20xf32, #tpu.memory_space<vmem>>, %arg6: memref<4x20xf32, #tpu.memory_space<vmem>>, %arg7: memref<4x20x6xf32, #tpu.memory_space<vmem>>, %arg8: memref<1x6xf32, #tpu.memory_space<vmem>>, %arg9: memref<4x6xf32, #tpu.memory_space<vmem>>, %arg10: memref<200x20xf32, #tpu.memory_space<vmem>>, %arg11: memref<104x20xf32, #tpu.memory_space<vmem>>, %arg12: memref<56x20xf32, #tpu.memory_space<vmem>>, %arg13: memref<24x20xf32, #tpu.memory_space<vmem>>) attributes {dimension_semantics = [#tpu.dimension_semantics<arbitrary>], iteration_bounds = array<i64: 1>, scalar_prefetch = 0 : i64, scratch_operands = 4 : i64, tpu.core_type = #tpu.core_type<tc>, window_params = [{pipeline_mode = #tpu.pipeline_mode<synchronous>, transform_indices = @transform_0, window_bounds = array<i64: 192, 12>}, {pipeline_mode = #tpu.pipeline_mode<synchronous>, transform_indices = @transform_1, window_bounds = array<i64: 12, 20>}, {pipeline_mode = #tpu.pipeline_mode<synchronous>, transform_indices = @transform_2, window_bounds = array<i64: 3, 20, 20>}, {pipeline_mode = #tpu.pipeline_mode<synchronous>, transform_indices = @transform_3, window_bounds = array<i64: 3, 20, 20>}, {pipeline_mode = #tpu.pipeline_mode<synchronous>, transform_indices = @transform_4, window_bounds = array<i64: 3, 20, 20>}, {pipeline_mode = #tpu.pipeline_mode<synchronous>, transform_indices = @transform_5, window_bounds = array<i64: 4, 20>}, {pipeline_mode = #tpu.pipeline_mode<synchronous>, transform_indices = @transform_6, window_bounds = array<i64: 4, 20, 6>}, {pipeline_mode = #tpu.pipeline_mode<synchronous>, transform_indices = @transform_7, window_bounds = array<i64: 1, 6>}, {pipeline_mode = #tpu.pipeline_mode<synchronous>, transform_indices = @transform_8, window_bounds = array<i64: 4, 6>}]} {
    %cst = arith.constant 0.000000e+00 : f32
    %0 = vector.broadcast %cst : f32 to vector<8x20xf32>
    %c0 = arith.constant 0 : index
    %c0_0 = arith.constant 0 : index
    %1 = vector.load %arg1[%c0, %c0_0] : memref<192x12xf32, #tpu.memory_space<vmem>>, vector<192x12xf32>
    %c0_1 = arith.constant 0 : index
    %c0_2 = arith.constant 0 : index
    %2 = vector.load %arg2[%c0_1, %c0_2] : memref<12x20xf32, #tpu.memory_space<vmem>>, vector<12x20xf32>
    %cst_3 = arith.constant dense<0.000000e+00> : vector<192x20xf32>
    %3 = tpu.matmul %1, %2, %cst_3 {dimension_numbers = #tpu.dot_dimension_numbers<[1], [0], [0], [1], [0, 0, 1, 1], [], []>} : vector<192x12xf32>, vector<12x20xf32>, vector<192x20xf32> -> vector<192x20xf32>
    %c0_4 = arith.constant 0 : index
    %c0_5 = arith.constant 0 : index
    %4 = vector.load %arg6[%c0_4, %c0_5] : memref<4x20xf32, #tpu.memory_space<vmem>>, vector<1x20xf32>
    %5 = vector.broadcast %4 : vector<1x20xf32> to vector<192x20xf32>
    %6 = arith.addf %3, %5 : vector<192x20xf32>
    %cst_6 = arith.constant 0.000000e+00 : f32
    %7 = vector.broadcast %cst_6 : f32 to vector<192x20xf32>
    %8 = arith.maximumf %6, %7 : vector<192x20xf32>
    %c0_7 = arith.constant 0 : index
    %c0_8 = arith.constant 0 : index
    %9 = vector.load %arg10[%c0_7, %c0_8] : memref<200x20xf32, #tpu.memory_space<vmem>>, vector<192x20xf32>
    tpu.vector_store %arg10[%c0_7, %c0_8], %8 {strides = array<i32>} : memref<200x20xf32, #tpu.memory_space<vmem>>, vector<192x20xf32>,
    %c192 = arith.constant 192 : index
    %c0_9 = arith.constant 0 : index
    %10 = vector.load %arg10[%c192, %c0_9] : memref<200x20xf32, #tpu.memory_space<vmem>>, vector<8x20xf32>
    tpu.vector_store %arg10[%c192, %c0_9], %0 {strides = array<i32>} : memref<200x20xf32, #tpu.memory_space<vmem>>, vector<8x20xf32>,
    %c0_10 = arith.constant 0 : index
    %c0_11 = arith.constant 0 : index
    %11 = tpu.strided_load %arg10[%c0_10, %c0_11] {strides = array<i32: 2, 1>} : memref<200x20xf32, #tpu.memory_space<vmem>>, vector<96x20xf32>
    %c0_12 = arith.constant 0 : index
    %c0_13 = arith.constant 0 : index
    %c0_14 = arith.constant 0 : index
    %12 = vector.load %arg3[%c0_12, %c0_13, %c0_14] : memref<3x20x20xf32, #tpu.memory_space<vmem>>, vector<1x20x20xf32>
    %13 = vector.shape_cast %12 : vector<1x20x20xf32> to vector<20x20xf32>
    %cst_15 = arith.constant dense<0.000000e+00> : vector<96x20xf32>
    %14 = tpu.matmul %11, %13, %cst_15 {dimension_numbers = #tpu.dot_dimension_numbers<[1], [0], [0], [1], [0, 0, 1, 1], [], []>} : vector<96x20xf32>, vector<20x20xf32>, vector<96x20xf32> -> vector<96x20xf32>
    %c1 = arith.constant 1 : index
    %c0_16 = arith.constant 0 : index
    %15 = tpu.strided_load %arg10[%c1, %c0_16] {strides = array<i32: 2, 1>} : memref<200x20xf32, #tpu.memory_space<vmem>>, vector<96x20xf32>
    %c1_17 = arith.constant 1 : index
    %c0_18 = arith.constant 0 : index
    %c0_19 = arith.constant 0 : index
    %16 = vector.load %arg3[%c1_17, %c0_18, %c0_19] : memref<3x20x20xf32, #tpu.memory_space<vmem>>, vector<1x20x20xf32>
    %17 = vector.shape_cast %16 : vector<1x20x20xf32> to vector<20x20xf32>
    %cst_20 = arith.constant dense<0.000000e+00> : vector<96x20xf32>
    %18 = tpu.matmul %15, %17, %cst_20 {dimension_numbers = #tpu.dot_dimension_numbers<[1], [0], [0], [1], [0, 0, 1, 1], [], []>} : vector<96x20xf32>, vector<20x20xf32>, vector<96x20xf32> -> vector<96x20xf32>
    %19 = arith.addf %14, %18 : vector<96x20xf32>
    %c2 = arith.constant 2 : index
    %c0_21 = arith.constant 0 : index
    %20 = tpu.strided_load %arg10[%c2, %c0_21] {strides = array<i32: 2, 1>} : memref<200x20xf32, #tpu.memory_space<vmem>>, vector<96x20xf32>
    %c2_22 = arith.constant 2 : index
    %c0_23 = arith.constant 0 : index
    %c0_24 = arith.constant 0 : index
    %21 = vector.load %arg3[%c2_22, %c0_23, %c0_24] : memref<3x20x20xf32, #tpu.memory_space<vmem>>, vector<1x20x20xf32>
    %22 = vector.shape_cast %21 : vector<1x20x20xf32> to vector<20x20xf32>
    %cst_25 = arith.constant dense<0.000000e+00> : vector<96x20xf32>
    %23 = tpu.matmul %20, %22, %cst_25 {dimension_numbers = #tpu.dot_dimension_numbers<[1], [0], [0], [1], [0, 0, 1, 1], [], []>} : vector<96x20xf32>, vector<20x20xf32>, vector<96x20xf32> -> vector<96x20xf32>
    %24 = arith.addf %19, %23 : vector<96x20xf32>
    %c1_26 = arith.constant 1 : index
    %c0_27 = arith.constant 0 : index
    %25 = vector.load %arg6[%c1_26, %c0_27] : memref<4x20xf32, #tpu.memory_space<vmem>>, vector<1x20xf32>
    %26 = vector.broadcast %25 : vector<1x20xf32> to vector<96x20xf32>
    %27 = arith.addf %24, %26 : vector<96x20xf32>
    %cst_28 = arith.constant 0.000000e+00 : f32
    %28 = vector.broadcast %cst_28 : f32 to vector<96x20xf32>
    %29 = arith.maximumf %27, %28 : vector<96x20xf32>
    %c0_29 = arith.constant 0 : index
    %c0_30 = arith.constant 0 : index
    %30 = vector.load %arg11[%c0_29, %c0_30] : memref<104x20xf32, #tpu.memory_space<vmem>>, vector<96x20xf32>
    tpu.vector_store %arg11[%c0_29, %c0_30], %29 {strides = array<i32>} : memref<104x20xf32, #tpu.memory_space<vmem>>, vector<96x20xf32>,
    %c96 = arith.constant 96 : index
    %c0_31 = arith.constant 0 : index
    %31 = vector.load %arg11[%c96, %c0_31] : memref<104x20xf32, #tpu.memory_space<vmem>>, vector<8x20xf32>
    tpu.vector_store %arg11[%c96, %c0_31], %0 {strides = array<i32>} : memref<104x20xf32, #tpu.memory_space<vmem>>, vector<8x20xf32>,
    %c0_32 = arith.constant 0 : index
    %c0_33 = arith.constant 0 : index
    %32 = tpu.strided_load %arg11[%c0_32, %c0_33] {strides = array<i32: 2, 1>} : memref<104x20xf32, #tpu.memory_space<vmem>>, vector<48x20xf32>
    %c0_34 = arith.constant 0 : index
    %c0_35 = arith.constant 0 : index
    %c0_36 = arith.constant 0 : index
    %33 = vector.load %arg4[%c0_34, %c0_35, %c0_36] : memref<3x20x20xf32, #tpu.memory_space<vmem>>, vector<1x20x20xf32>
    %34 = vector.shape_cast %33 : vector<1x20x20xf32> to vector<20x20xf32>
    %cst_37 = arith.constant dense<0.000000e+00> : vector<48x20xf32>
    %35 = tpu.matmul %32, %34, %cst_37 {dimension_numbers = #tpu.dot_dimension_numbers<[1], [0], [0], [1], [0, 0, 1, 1], [], []>} : vector<48x20xf32>, vector<20x20xf32>, vector<48x20xf32> -> vector<48x20xf32>
    %c1_38 = arith.constant 1 : index
    %c0_39 = arith.constant 0 : index
    %36 = tpu.strided_load %arg11[%c1_38, %c0_39] {strides = array<i32: 2, 1>} : memref<104x20xf32, #tpu.memory_space<vmem>>, vector<48x20xf32>
    %c1_40 = arith.constant 1 : index
    %c0_41 = arith.constant 0 : index
    %c0_42 = arith.constant 0 : index
    %37 = vector.load %arg4[%c1_40, %c0_41, %c0_42] : memref<3x20x20xf32, #tpu.memory_space<vmem>>, vector<1x20x20xf32>
    %38 = vector.shape_cast %37 : vector<1x20x20xf32> to vector<20x20xf32>
    %cst_43 = arith.constant dense<0.000000e+00> : vector<48x20xf32>
    %39 = tpu.matmul %36, %38, %cst_43 {dimension_numbers = #tpu.dot_dimension_numbers<[1], [0], [0], [1], [0, 0, 1, 1], [], []>} : vector<48x20xf32>, vector<20x20xf32>, vector<48x20xf32> -> vector<48x20xf32>
    %40 = arith.addf %35, %39 : vector<48x20xf32>
    %c2_44 = arith.constant 2 : index
    %c0_45 = arith.constant 0 : index
    %41 = tpu.strided_load %arg11[%c2_44, %c0_45] {strides = array<i32: 2, 1>} : memref<104x20xf32, #tpu.memory_space<vmem>>, vector<48x20xf32>
    %c2_46 = arith.constant 2 : index
    %c0_47 = arith.constant 0 : index
    %c0_48 = arith.constant 0 : index
    %42 = vector.load %arg4[%c2_46, %c0_47, %c0_48] : memref<3x20x20xf32, #tpu.memory_space<vmem>>, vector<1x20x20xf32>
    %43 = vector.shape_cast %42 : vector<1x20x20xf32> to vector<20x20xf32>
    %cst_49 = arith.constant dense<0.000000e+00> : vector<48x20xf32>
    %44 = tpu.matmul %41, %43, %cst_49 {dimension_numbers = #tpu.dot_dimension_numbers<[1], [0], [0], [1], [0, 0, 1, 1], [], []>} : vector<48x20xf32>, vector<20x20xf32>, vector<48x20xf32> -> vector<48x20xf32>
    %45 = arith.addf %40, %44 : vector<48x20xf32>
    %c2_50 = arith.constant 2 : index
    %c0_51 = arith.constant 0 : index
    %46 = vector.load %arg6[%c2_50, %c0_51] : memref<4x20xf32, #tpu.memory_space<vmem>>, vector<1x20xf32>
    %47 = vector.broadcast %46 : vector<1x20xf32> to vector<48x20xf32>
    %48 = arith.addf %45, %47 : vector<48x20xf32>
    %cst_52 = arith.constant 0.000000e+00 : f32
    %49 = vector.broadcast %cst_52 : f32 to vector<48x20xf32>
    %50 = arith.maximumf %48, %49 : vector<48x20xf32>
    %c0_53 = arith.constant 0 : index
    %c0_54 = arith.constant 0 : index
    %51 = vector.load %arg12[%c0_53, %c0_54] : memref<56x20xf32, #tpu.memory_space<vmem>>, vector<48x20xf32>
    tpu.vector_store %arg12[%c0_53, %c0_54], %50 {strides = array<i32>} : memref<56x20xf32, #tpu.memory_space<vmem>>, vector<48x20xf32>,
    %c48 = arith.constant 48 : index
    %c0_55 = arith.constant 0 : index
    %52 = vector.load %arg12[%c48, %c0_55] : memref<56x20xf32, #tpu.memory_space<vmem>>, vector<8x20xf32>
    tpu.vector_store %arg12[%c48, %c0_55], %0 {strides = array<i32>} : memref<56x20xf32, #tpu.memory_space<vmem>>, vector<8x20xf32>,
    %c0_56 = arith.constant 0 : index
    %c0_57 = arith.constant 0 : index
    %53 = tpu.strided_load %arg12[%c0_56, %c0_57] {strides = array<i32: 2, 1>} : memref<56x20xf32, #tpu.memory_space<vmem>>, vector<24x20xf32>
    %c0_58 = arith.constant 0 : index
    %c0_59 = arith.constant 0 : index
    %c0_60 = arith.constant 0 : index
    %54 = vector.load %arg5[%c0_58, %c0_59, %c0_60] : memref<3x20x20xf32, #tpu.memory_space<vmem>>, vector<1x20x20xf32>
    %55 = vector.shape_cast %54 : vector<1x20x20xf32> to vector<20x20xf32>
    %cst_61 = arith.constant dense<0.000000e+00> : vector<24x20xf32>
    %56 = tpu.matmul %53, %55, %cst_61 {dimension_numbers = #tpu.dot_dimension_numbers<[1], [0], [0], [1], [0, 0, 1, 1], [], []>} : vector<24x20xf32>, vector<20x20xf32>, vector<24x20xf32> -> vector<24x20xf32>
    %c1_62 = arith.constant 1 : index
    %c0_63 = arith.constant 0 : index
    %57 = tpu.strided_load %arg12[%c1_62, %c0_63] {strides = array<i32: 2, 1>} : memref<56x20xf32, #tpu.memory_space<vmem>>, vector<24x20xf32>
    %c1_64 = arith.constant 1 : index
    %c0_65 = arith.constant 0 : index
    %c0_66 = arith.constant 0 : index
    %58 = vector.load %arg5[%c1_64, %c0_65, %c0_66] : memref<3x20x20xf32, #tpu.memory_space<vmem>>, vector<1x20x20xf32>
    %59 = vector.shape_cast %58 : vector<1x20x20xf32> to vector<20x20xf32>
    %cst_67 = arith.constant dense<0.000000e+00> : vector<24x20xf32>
    %60 = tpu.matmul %57, %59, %cst_67 {dimension_numbers = #tpu.dot_dimension_numbers<[1], [0], [0], [1], [0, 0, 1, 1], [], []>} : vector<24x20xf32>, vector<20x20xf32>, vector<24x20xf32> -> vector<24x20xf32>
    %61 = arith.addf %56, %60 : vector<24x20xf32>
    %c2_68 = arith.constant 2 : index
    %c0_69 = arith.constant 0 : index
    %62 = tpu.strided_load %arg12[%c2_68, %c0_69] {strides = array<i32: 2, 1>} : memref<56x20xf32, #tpu.memory_space<vmem>>, vector<24x20xf32>
    %c2_70 = arith.constant 2 : index
    %c0_71 = arith.constant 0 : index
    %c0_72 = arith.constant 0 : index
    %63 = vector.load %arg5[%c2_70, %c0_71, %c0_72] : memref<3x20x20xf32, #tpu.memory_space<vmem>>, vector<1x20x20xf32>
    %64 = vector.shape_cast %63 : vector<1x20x20xf32> to vector<20x20xf32>
    %cst_73 = arith.constant dense<0.000000e+00> : vector<24x20xf32>
    %65 = tpu.matmul %62, %64, %cst_73 {dimension_numbers = #tpu.dot_dimension_numbers<[1], [0], [0], [1], [0, 0, 1, 1], [], []>} : vector<24x20xf32>, vector<20x20xf32>, vector<24x20xf32> -> vector<24x20xf32>
    %66 = arith.addf %61, %65 : vector<24x20xf32>
    %c3 = arith.constant 3 : index
    %c0_74 = arith.constant 0 : index
    %67 = vector.load %arg6[%c3, %c0_74] : memref<4x20xf32, #tpu.memory_space<vmem>>, vector<1x20xf32>
    %68 = vector.broadcast %67 : vector<1x20xf32> to vector<24x20xf32>
    %69 = arith.addf %66, %68 : vector<24x20xf32>
    %cst_75 = arith.constant 0.000000e+00 : f32
    %70 = vector.broadcast %cst_75 : f32 to vector<24x20xf32>
    %71 = arith.maximumf %69, %70 : vector<24x20xf32>
    %c0_76 = arith.constant 0 : index
    %c0_77 = arith.constant 0 : index
    %72 = vector.load %arg13[%c0_76, %c0_77] : memref<24x20xf32, #tpu.memory_space<vmem>>, vector<24x20xf32>
    tpu.vector_store %arg13[%c0_76, %c0_77], %71 {strides = array<i32>} : memref<24x20xf32, #tpu.memory_space<vmem>>, vector<24x20xf32>,
    %c0_78 = arith.constant 0 : index
    %c0_79 = arith.constant 0 : index
    %73 = tpu.strided_load %arg13[%c0_78, %c0_79] {strides = array<i32: 6, 1>} : memref<24x20xf32, #tpu.memory_space<vmem>>, vector<4x20xf32>
    %c0_80 = arith.constant 0 : index
    %c0_81 = arith.constant 0 : index
    %c0_82 = arith.constant 0 : index
    %74 = vector.load %arg7[%c0_80, %c0_81, %c0_82] : memref<4x20x6xf32, #tpu.memory_space<vmem>>, vector<1x20x6xf32>
    %75 = vector.shape_cast %74 : vector<1x20x6xf32> to vector<20x6xf32>
    %cst_83 = arith.constant dense<0.000000e+00> : vector<4x6xf32>
    %76 = tpu.matmul %73, %75, %cst_83 {dimension_numbers = #tpu.dot_dimension_numbers<[1], [0], [0], [1], [0, 0, 1, 1], [], []>} : vector<4x20xf32>, vector<20x6xf32>, vector<4x6xf32> -> vector<4x6xf32>
    %c1_84 = arith.constant 1 : index
    %c0_85 = arith.constant 0 : index
    %77 = tpu.strided_load %arg13[%c1_84, %c0_85] {strides = array<i32: 6, 1>} : memref<24x20xf32, #tpu.memory_space<vmem>>, vector<4x20xf32>
    %c1_86 = arith.constant 1 : index
    %c0_87 = arith.constant 0 : index
    %c0_88 = arith.constant 0 : index
    %78 = vector.load %arg7[%c1_86, %c0_87, %c0_88] : memref<4x20x6xf32, #tpu.memory_space<vmem>>, vector<1x20x6xf32>
    %79 = vector.shape_cast %78 : vector<1x20x6xf32> to vector<20x6xf32>
    %cst_89 = arith.constant dense<0.000000e+00> : vector<4x6xf32>
    %80 = tpu.matmul %77, %79, %cst_89 {dimension_numbers = #tpu.dot_dimension_numbers<[1], [0], [0], [1], [0, 0, 1, 1], [], []>} : vector<4x20xf32>, vector<20x6xf32>, vector<4x6xf32> -> vector<4x6xf32>
    %81 = arith.addf %76, %80 : vector<4x6xf32>
    %c2_90 = arith.constant 2 : index
    %c0_91 = arith.constant 0 : index
    %82 = tpu.strided_load %arg13[%c2_90, %c0_91] {strides = array<i32: 6, 1>} : memref<24x20xf32, #tpu.memory_space<vmem>>, vector<4x20xf32>
    %c2_92 = arith.constant 2 : index
    %c0_93 = arith.constant 0 : index
    %c0_94 = arith.constant 0 : index
    %83 = vector.load %arg7[%c2_92, %c0_93, %c0_94] : memref<4x20x6xf32, #tpu.memory_space<vmem>>, vector<1x20x6xf32>
    %84 = vector.shape_cast %83 : vector<1x20x6xf32> to vector<20x6xf32>
    %cst_95 = arith.constant dense<0.000000e+00> : vector<4x6xf32>
    %85 = tpu.matmul %82, %84, %cst_95 {dimension_numbers = #tpu.dot_dimension_numbers<[1], [0], [0], [1], [0, 0, 1, 1], [], []>} : vector<4x20xf32>, vector<20x6xf32>, vector<4x6xf32> -> vector<4x6xf32>
    %86 = arith.addf %81, %85 : vector<4x6xf32>
    %c3_96 = arith.constant 3 : index
    %c0_97 = arith.constant 0 : index
    %87 = tpu.strided_load %arg13[%c3_96, %c0_97] {strides = array<i32: 6, 1>} : memref<24x20xf32, #tpu.memory_space<vmem>>, vector<4x20xf32>
    %c3_98 = arith.constant 3 : index
    %c0_99 = arith.constant 0 : index
    %c0_100 = arith.constant 0 : index
    %88 = vector.load %arg7[%c3_98, %c0_99, %c0_100] : memref<4x20x6xf32, #tpu.memory_space<vmem>>, vector<1x20x6xf32>
    %89 = vector.shape_cast %88 : vector<1x20x6xf32> to vector<20x6xf32>
    %cst_101 = arith.constant dense<0.000000e+00> : vector<4x6xf32>
    %90 = tpu.matmul %87, %89, %cst_101 {dimension_numbers = #tpu.dot_dimension_numbers<[1], [0], [0], [1], [0, 0, 1, 1], [], []>} : vector<4x20xf32>, vector<20x6xf32>, vector<4x6xf32> -> vector<4x6xf32>
    %91 = arith.addf %86, %90 : vector<4x6xf32>
    %c0_102 = arith.constant 0 : index
    %c0_103 = arith.constant 0 : index
    %92 = vector.load %arg8[%c0_102, %c0_103] : memref<1x6xf32, #tpu.memory_space<vmem>>, vector<1x6xf32>
    %93 = vector.broadcast %92 : vector<1x6xf32> to vector<4x6xf32>
    %94 = arith.addf %91, %93 : vector<4x6xf32>
    %c0_104 = arith.constant 0 : index
    %c0_105 = arith.constant 0 : index
    %95 = vector.load %arg9[%c0_104, %c0_105] : memref<4x6xf32, #tpu.memory_space<vmem>>, vector<4x6xf32>
    tpu.vector_store %arg9[%c0_104, %c0_105], %94 {strides = array<i32>} : memref<4x6xf32, #tpu.memory_space<vmem>>, vector<4x6xf32>,
    return
  }
  func.func @transform_0(%arg0: i32) -> (i32, i32) {
    %c0_i32 = arith.constant 0 : i32
    %c0_i32_0 = arith.constant 0 : i32
    %c0_i32_1 = arith.constant 0 : i32
    return %c0_i32, %c0_i32_0 : i32, i32
  }
  func.func @transform_1(%arg0: i32) -> (i32, i32) {
    %c0_i32 = arith.constant 0 : i32
    %c0_i32_0 = arith.constant 0 : i32
    %c0_i32_1 = arith.constant 0 : i32
    return %c0_i32, %c0_i32_0 : i32, i32
  }
  func.func @transform_2(%arg0: i32) -> (i32, i32, i32) {
    %c0_i32 = arith.constant 0 : i32
    %c0_i32_0 = arith.constant 0 : i32
    %c0_i32_1 = arith.constant 0 : i32
    %c0_i32_2 = arith.constant 0 : i32
    return %c0_i32, %c0_i32_0, %c0_i32_1 : i32, i32, i32
  }
  func.func @transform_3(%arg0: i32) -> (i32, i32, i32) {
    %c0_i32 = arith.constant 0 : i32
    %c0_i32_0 = arith.constant 0 : i32
    %c0_i32_1 = arith.constant 0 : i32
    %c0_i32_2 = arith.constant 0 : i32
    return %c0_i32, %c0_i32_0, %c0_i32_1 : i32, i32, i32
  }
  func.func @transform_4(%arg0: i32) -> (i32, i32, i32) {
    %c0_i32 = arith.constant 0 : i32
    %c0_i32_0 = arith.constant 0 : i32
    %c0_i32_1 = arith.constant 0 : i32
    %c0_i32_2 = arith.constant 0 : i32
    return %c0_i32, %c0_i32_0, %c0_i32_1 : i32, i32, i32
  }
  func.func @transform_5(%arg0: i32) -> (i32, i32) {
    %c0_i32 = arith.constant 0 : i32
    %c0_i32_0 = arith.constant 0 : i32
    %c0_i32_1 = arith.constant 0 : i32
    return %c0_i32, %c0_i32_0 : i32, i32
  }
  func.func @transform_6(%arg0: i32) -> (i32, i32, i32) {
    %c0_i32 = arith.constant 0 : i32
    %c0_i32_0 = arith.constant 0 : i32
    %c0_i32_1 = arith.constant 0 : i32
    %c0_i32_2 = arith.constant 0 : i32
    return %c0_i32, %c0_i32_0, %c0_i32_1 : i32, i32, i32
  }
  func.func @transform_7(%arg0: i32) -> (i32, i32) {
    %c0_i32 = arith.constant 0 : i32
    %c0_i32_0 = arith.constant 0 : i32
    %c0_i32_1 = arith.constant 0 : i32
    return %c0_i32, %c0_i32_0 : i32, i32
  }
  func.func @transform_8(%arg0: i32) -> (i32, i32) {
    %c0_i32 = arith.constant 0 : i32
    %c0_i32_0 = arith.constant 0 : i32
    %c0_i32_1 = arith.constant 0 : i32
    return %c0_i32, %c0_i32_0 : i32, i32
  }
}

</mosaic_0001>

<bundles_post_ra>
// kernel: forward.1
= control target key start
LH: loop header
LB: loop body
LE: loop exit
PB: predicated region body
PF: predicated region fallthrough
CT: control target
= control target key end

     0   :  { %vm134_vm0 = vcmask 1043456   ;;  %vm2721_vm1 = vmmov 1   ;;  %vm61_vm3 = vcmask 97280   ;;  %s3225_s0 = inlined_call_operand.vmem [shape: f32[192,12], index: 0, kind: input, shape index: {}]   ;;  %s3226_s1 = inlined_call_operand.vmem [shape: f32[12,20], index: 1, kind: input, shape index: {}]   ;;  %s3227_s2 = inlined_call_operand.vmem [shape: f32[3,20,20], index: 2, kind: input, shape index: {}]   ;;  %s3228_s3 = inlined_call_operand.vmem [shape: f32[3,20,20], index: 3, kind: input, shape index: {}]   ;;  %s3229_s4 = inlined_call_operand.vmem [shape: f32[3,20,20], index: 4, kind: input, shape index: {}]   ;;  %s3230_s5 = inlined_call_operand.vmem [shape: f32[4,20], index: 5, kind: input, shape index: {}]   ;;  %s3231_s6 = inlined_call_operand.vmem [shape: f32[4,20,6], index: 6, kind: input, shape index: {}]   ;;  %s3232_s7 = inlined_call_operand.vmem [shape: f32[1,6], index: 7, kind: input, shape index: {}]   ;;  %s3233_s8 = inlined_call_operand.hbm [shape: f32[4,6], index: 8, kind: output, shape index: {}]  }
   0x1   :  { %v54_v0 = vld [vmem:[%s3226_s1] sm:$0xff]  ;;  %v55_v1 = vld [vmem:[%s3226_s1 + $0x8] sm:$0xf]  ;;  %vm2606_vm2 = vmpackc.low %vm134_vm0, %vm2721_vm1 }
   0x2   :  { %v30_v2 = vld [vmem:[%s3225_s0] sm:$0xff]  ;;  %v2605_v3 = vpack.c.bf16 %v55_v1, %v54_v0  ;;  %v31_v4 = vld [vmem:[%s3225_s0 + $0x8] sm:$0xff]  ;;  %v32_v5 = vld [vmem:[%s3225_s0 + $0x10] sm:$0xff] }
   0x3   :  { %2371 = vmatprep.mubr.msk.f32.mxu0 %vm61_vm3, %v30_v2  ;;  %v33_v6 = vld [vmem:[%s3225_s0 + $0x18] sm:$0xff]  ;;  %v34_v7 = vld [vmem:[%s3225_s0 + $0x20] sm:$0xff] }
   0x4   :  { %2607 = vmatprep.subr.msk.bf16.mxu0 %vm2606_vm2, %v2605_v3 }
   0x5   :  { %2610 = vmatpush3.bf16.msk.msra.mxu0 %vm2606_vm2, %v2605_v3 }
   0x8   :  { %2372 = vmatmul.mubr.msk.f32.vlgmr.msra.gmra.mrb[0].mxu0 %vm61_vm3, %v31_v4 }
   0x9   :  { %2374 = vmatprep.mubr.msk.f32.mxu0 %vm61_vm3, %v32_v5 }
   0xa   :  { %13 = vsyncpa [#allocation7], 0  ;;  %v35_v8 = vld [vmem:[%s3225_s0 + $0x28] sm:$0xff]  ;;  %v36_v9 = vld [vmem:[%s3225_s0 + $0x30] sm:$0xff]  ;;  %vm347_vm4 = vcmask 162816   ;;  %v2722_v34 = vmov 0.0  }
   0xb   :  { %v37_v10 = vld [vmem:[%s3225_s0 + $0x38] sm:$0xff]  ;;  %v38_v11 = vld [vmem:[%s3225_s0 + $0x40] sm:$0xff]  ;;  %v39_v12 = vld [vmem:[%s3225_s0 + $0x48] sm:$0xff]  ;;  %372 = vst.msk [vmem:[#allocation2 + $0xc0] sm:$0xff] %vm347_vm4, %v2722_v34  ;;  %vm2724_vm5 = vmmov 0   ;;  %s2725_s17 = smov [#allocation6]  }
   0xc   :  { %2375 = vmatmul.mubr.msk.f32.gmra.mrb[2].mxu0 %vm61_vm3, %v33_v6  ;;  %v40_v13 = vld [vmem:[%s3225_s0 + $0x50] sm:$0xff]  ;;  %v41_v14 = vld [vmem:[%s3225_s0 + $0x58] sm:$0xff]  ;;  %v42_v15 = vld [vmem:[%s3225_s0 + $0x60] sm:$0xff]  ;;  %1000 = vst.msk [vmem:[#allocation3 + $0x60] sm:$0xff] %vm347_vm4, %v2722_v34  ;;  %vm2082_vm6 = vcmask 44032  }
   0xd   :  { %2377 = vmatprep.mubr.msk.f32.mxu0 %vm61_vm3, %v34_v7  ;;  %v43_v16 = vld [vmem:[%s3225_s0 + $0x68] sm:$0xff]  ;;  %v44_v17 = vld [vmem:[%s3225_s0 + $0x70] sm:$0xff]  ;;  %v45_v18 = vld [vmem:[%s3225_s0 + $0x78] sm:$0xff]  ;;  %1424 = vst.msk [vmem:[#allocation4 + $0x30] sm:$0xff] %vm347_vm4, %v2722_v34 }
   0xe   :  { %v46_v19 = vld [vmem:[%s3225_s0 + $0x80] sm:$0xff]  ;;  %v47_v20 = vld [vmem:[%s3225_s0 + $0x88] sm:$0xff]  ;;  %v48_v21 = vld [vmem:[%s3225_s0 + $0x90] sm:$0xff] }
   0xf   :  { %v49_v22 = vld [vmem:[%s3225_s0 + $0x98] sm:$0xff]  ;;  %v50_v23 = vld [vmem:[%s3225_s0 + $0xa0] sm:$0xff]  ;;  %v51_v24 = vld [vmem:[%s3225_s0 + $0xa8] sm:$0xff] }
  0x10   :  { %2378 = vmatmul.mubr.msk.f32.gmra.mrb[4].mxu0 %vm61_vm3, %v35_v8  ;;  %v52_v25 = vld [vmem:[%s3225_s0 + $0xb0] sm:$0xff]  ;;  %v53_v26 = vld [vmem:[%s3225_s0 + $0xb8] sm:$0xff]  ;;  %v2125_v28 = vld [vmem:[%s3227_s2 + $0x20] sm:$0xff] }
  0x11   :  { %2380 = vmatprep.mubr.msk.f32.mxu0 %vm61_vm3, %v36_v9  ;;  %v2124_v27 = vld [vmem:[%s3227_s2 + $0x18] sm:$0xff]  ;;  %v2126_v30 = vld [vmem:[%s3227_s2 + $0x28] sm:$0xf]  ;;  %v396_v31 = vld [vmem:[%s3227_s2] sm:$0xff] }
  0x12   :  { %v2611_v29 = vpack.c.bf16 %v2125_v28, %v2124_v27  ;;  %v397_v32 = vld [vmem:[%s3227_s2 + $0x8] sm:$0xff]  ;;  %v2170_v35 = vld [vmem:[%s3228_s3 + $0x18] sm:$0xff]  ;;  %v2171_v36 = vld [vmem:[%s3228_s3 + $0x20] sm:$0xff] }
  0x13   :  { %v2615_v33 = vpack.c.bf16 %v397_v32, %v396_v31  ;;  %v2623_v37 = vpack.c.bf16 %v2171_v36, %v2170_v35  ;;  %v2906_v38 = vld [vmem:[%s3230_s5] ss:$0 sm:$0xff]  ;;  %v398_v1 = vld [vmem:[%s3227_s2 + $0x10] sm:$0xf]  ;;  %v2154_v6 = vld [vmem:[%s3227_s2 + $0x38] sm:$0xff] }
  0x14   :  { %2381 = vmatmul.mubr.msk.f32.gmra.mrb[6].mxu0 %vm61_vm3, %v37_v10  ;;  %2612 = vmatprep.subr.bf16.mxu1 %v2611_v29  ;;  %v2153_v5 = vld [vmem:[%s3227_s2 + $0x30] sm:$0xff] }
  0x15   :  { %2383 = vmatprep.mubr.msk.f32.mxu0 %vm61_vm3, %v38_v11  ;;  %2614 = vmatpush3.bf16.msra.mxu1 %v2611_v29  ;;  %v2938_v11 = vpack.c.bf16 %v2154_v6, %v2153_v5 }
  0x16   :  { %2411 = vmatprep.subr.msk.mxu1 %vm134_vm0, %v2126_v30  ;;  %2624 = vmatprep.subr.bf16.mxu0 %v2623_v37 }
  0x17   :  { %2626 = vmatpush3.bf16.msra.mxu0 %v2623_v37 }
  0x18   :  { %2384 = vmatmul.mubr.msk.f32.gmra.mrb[8].mxu0 %vm61_vm3, %v39_v12 }
  0x19   :  { %2386 = vmatprep.mubr.msk.f32.mxu0 %vm61_vm3, %v40_v13  ;;  %2412 = vmatpush3.msk.msra.mxu1 %vm134_vm0, %v2126_v30 }
  0x1a   :  { %2616 = vmatprep.subr.bf16.mxu1 %v2615_v33 }
  0x1c   :  { %2387 = vmatmul.mubr.msk.f32.gmra.mrb[10].mxu0 %vm61_vm3, %v41_v14 }
  0x1d   :  { %2389 = vmatprep.mubr.msk.f32.mxu0 %vm61_vm3, %v42_v15 }
  0x20   :  { %2390 = vmatmul.mubr.msk.f32.gmra.mrb[12].mxu0 %vm61_vm3, %v43_v16 }
  0x21   :  { %2392 = vmatprep.mubr.msk.f32.mxu0 %vm61_vm3, %v44_v17 }
  0x24   :  { %2393 = vmatmul.mubr.msk.f32.gmra.mrb[14].mxu0 %vm61_vm3, %v45_v18 }
  0x25   :  { %2395 = vmatprep.mubr.msk.f32.mxu0 %vm61_vm3, %v46_v19 }
  0x28   :  { %2396 = vmatmul.mubr.msk.f32.gmra.mrb[16].mxu0 %vm61_vm3, %v47_v20 }
  0x29   :  { %2398 = vmatprep.mubr.msk.f32.mxu0 %vm61_vm3, %v48_v21 }
  0x2c   :  { %2399 = vmatmul.mubr.msk.f32.gmra.mrb[18].mxu0 %vm61_vm3, %v49_v22 }
  0x2d   :  { %2401 = vmatprep.mubr.msk.f32.mxu0 %vm61_vm3, %v50_v23 }
  0x30   :  { %2402 = vmatmul.mubr.msk.f32.gmra.mrb[20].mxu0 %vm61_vm3, %v51_v24 }
  0x31   :  { %2404 = vmatprep.mubr.msk.f32.mxu0 %vm61_vm3, %v52_v25 }
  0x34   :  { %2405 = vmatmul.mubr.msk.f32.gmra.mrb[22].mxu0 %vm61_vm3, %v53_v26 }
  0xdb   :  { %v2373_v39 = vpop.f32.mrb[0].mxu0 }
  0xdc   :  { %v210_v40 = vadd.f32 %v2373_v39, %v2906_v38  ;;  %v204_v41 = vpop.f32.mrb[1].mxu0 }
  0xdd   :  { %v205_v42 = vadd.f32 %v2906_v38, %v204_v41 }
  0xde   :  { %v324_v43 = vmax.f32 %v210_v40, 0.0 }
  0xdf   :  { %v323_v44 = vmax.f32 %v205_v42, 0.0  ;;  %v2376_v45 = vpop.f32.mrb[2].mxu0 }
  0xe0   :  { %349 = vst.msk [vmem:[#allocation2 + $0x8] sm:$0xff] %vm347_vm4, %v324_v43  ;;  %v220_v46 = vadd.f32 %v2376_v45, %v2906_v38  ;;  %v214_v47 = vpop.f32.mrb[3].mxu0 }
  0xe1   :  { %348 = vst.msk [vmem:[#allocation2] sm:$0xff] %vm347_vm4, %v323_v44  ;;  %v215_v48 = vadd.f32 %v2906_v38, %v214_v47 }
  0xe2   :  { %v326_v49 = vmax.f32 %v220_v46, 0.0 }
  0xe3   :  { %v325_v50 = vmax.f32 %v215_v48, 0.0  ;;  %v2379_v51 = vpop.f32.mrb[4].mxu0 }
  0xe4   :  { %351 = vst.msk [vmem:[#allocation2 + $0x18] sm:$0xff] %vm347_vm4, %v326_v49  ;;  %v230_v52 = vadd.f32 %v2379_v51, %v2906_v38  ;;  %v224_v53 = vpop.f32.mrb[5].mxu0 }
  0xe5   :  { %350 = vst.msk [vmem:[#allocation2 + $0x10] sm:$0xff] %vm347_vm4, %v325_v50  ;;  %v225_v54 = vadd.f32 %v2906_v38, %v224_v53 }
  0xe6   :  { %v328_v55 = vmax.f32 %v230_v52, 0.0 }
  0xe7   :  { %v327_v56 = vmax.f32 %v225_v54, 0.0  ;;  %v2382_v57 = vpop.f32.mrb[6].mxu0 }
  0xe8   :  { %353 = vst.msk [vmem:[#allocation2 + $0x28] sm:$0xff] %vm347_vm4, %v328_v55  ;;  %v240_v58 = vadd.f32 %v2382_v57, %v2906_v38  ;;  %v234_v59 = vpop.f32.mrb[7].mxu0  ;;  %v400_v60 = vld [vmem:[#allocation2 + $0x1] ss:$2 sm:$0xff] }
  0xe9   :  { %352 = vst.msk [vmem:[#allocation2 + $0x20] sm:$0xff] %vm347_vm4, %v327_v56  ;;  %v235_v61 = vadd.f32 %v2906_v38, %v234_v59  ;;  %2413 = vmatprep.mubr.msk.f32.mxu1 %vm347_vm4, %v400_v60 }
  0xea   :  { %v330_v62 = vmax.f32 %v240_v58, 0.0 }
  0xeb   :  { %v329_v63 = vmax.f32 %v235_v61, 0.0  ;;  %v2385_v0 = vpop.f32.mrb[8].mxu0 }
  0xec   :  { %355 = vst.msk [vmem:[#allocation2 + $0x38] sm:$0xff] %vm347_vm4, %v330_v62  ;;  %v250_v2 = vadd.f32 %v2385_v0, %v2906_v38  ;;  %v244_v3 = vpop.f32.mrb[9].mxu0  ;;  %v402_v4 = vld [vmem:[#allocation2 + $0x11] ss:$2 sm:$0xff] }
  0xed   :  { %354 = vst.msk [vmem:[#allocation2 + $0x30] sm:$0xff] %vm347_vm4, %v329_v63  ;;  %v245_v7 = vadd.f32 %v2906_v38, %v244_v3  ;;  %2414 = vmatmul.mubr.msk.f32.vlgmr.msra.gmra.mrb[0].mxu1 %vm347_vm4, %v402_v4 }
  0xee   :  { %v332_v8 = vmax.f32 %v250_v2, 0.0  ;;  %2618 = vmatpush3.bf16.msra.mxu1 %v2615_v33  ;;  %v2155_v2 = vld [vmem:[%s3227_s2 + $0x40] sm:$0xf] }
  0xef   :  { %v331_v9 = vmax.f32 %v245_v7, 0.0  ;;  %v2388_v10 = vpop.f32.mrb[10].mxu0  ;;  %2435 = vmatprep.subr.msk.mxu1 %vm134_vm0, %v398_v1 }
  0xf0   :  { %357 = vst.msk [vmem:[#allocation2 + $0x48] sm:$0xff] %vm347_vm4, %v332_v8  ;;  %v260_v12 = vadd.f32 %v2388_v10, %v2906_v38  ;;  %v254_v13 = vpop.f32.mrb[11].mxu0  ;;  %v404_v14 = vld [vmem:[#allocation2 + $0x21] ss:$2 sm:$0xff]  ;;  %v377_v3 = vld [vmem:[#allocation2 + $0x20] ss:$2 sm:$0xff] }
  0xf1   :  { %356 = vst.msk [vmem:[#allocation2 + $0x40] sm:$0xff] %vm347_vm4, %v331_v9  ;;  %v255_v15 = vadd.f32 %v2906_v38, %v254_v13  ;;  %2416 = vmatprep.mubr.msk.f32.mxu1 %vm347_vm4, %v404_v14  ;;  %v756_v13 = vld [vmem:[#allocation2 + $0x2] ss:$2 sm:$0xff]  ;;  %v758_v14 = vld [vmem:[#allocation2 + $0x12] ss:$2 sm:$0xff] }
  0xf2   :  { %v334_v16 = vmax.f32 %v260_v12, 0.0  ;;  %2436 = vmatpush3.msk.msra.mxu1 %vm134_vm0, %v398_v1  ;;  %v373_v1 = vld [vmem:[#allocation2] ss:$2 sm:$0xff] }
  0xf3   :  { %v333_v17 = vmax.f32 %v255_v15, 0.0  ;;  %v2391_v18 = vpop.f32.mrb[12].mxu0  ;;  %2620 = vmatprep.subr.bf16.mxu1 %v2938_v11 }
  0xf4   :  { %359 = vst.msk [vmem:[#allocation2 + $0x58] sm:$0xff] %vm347_vm4, %v334_v16  ;;  %v270_v19 = vadd.f32 %v2391_v18, %v2906_v38  ;;  %v264_v20 = vpop.f32.mrb[13].mxu0  ;;  %v406_v21 = vld [vmem:[#allocation2 + $0x31] ss:$2 sm:$0xff]  ;;  %v379_v4 = vld [vmem:[#allocation2 + $0x30] ss:$2 sm:$0xff] }
  0xf5   :  { %358 = vst.msk [vmem:[#allocation2 + $0x50] sm:$0xff] %vm347_vm4, %v333_v17  ;;  %v265_v22 = vadd.f32 %v2906_v38, %v264_v20  ;;  %2417 = vmatmul.mubr.msk.f32.gmra.mrb[2].mxu1 %vm347_vm4, %v406_v21  ;;  %v760_v15 = vld [vmem:[#allocation2 + $0x22] ss:$2 sm:$0xff] }
  0xf6   :  { %v336_v23 = vmax.f32 %v270_v19, 0.0 }
  0xf7   :  { %v335_v24 = vmax.f32 %v265_v22, 0.0  ;;  %v2394_v25 = vpop.f32.mrb[14].mxu0 }
  0xf8   :  { %361 = vst.msk [vmem:[#allocation2 + $0x68] sm:$0xff] %vm347_vm4, %v336_v23  ;;  %v280_v26 = vadd.f32 %v2394_v25, %v2906_v38  ;;  %v274_v27 = vpop.f32.mrb[15].mxu0  ;;  %v408_v28 = vld [vmem:[#allocation2 + $0x41] ss:$2 sm:$0xff]  ;;  %v381_v5 = vld [vmem:[#allocation2 + $0x40] ss:$2 sm:$0xff] }
  0xf9   :  { %360 = vst.msk [vmem:[#allocation2 + $0x60] sm:$0xff] %vm347_vm4, %v335_v24  ;;  %v275_v29 = vadd.f32 %v2906_v38, %v274_v27  ;;  %2419 = vmatprep.mubr.msk.f32.mxu1 %vm347_vm4, %v408_v28  ;;  %v762_v16 = vld [vmem:[#allocation2 + $0x32] ss:$2 sm:$0xff]  ;;  %v2172_v25 = vld [vmem:[%s3228_s3 + $0x28] sm:$0xf] }
  0xfa   :  { %v338_v30 = vmax.f32 %v280_v26, 0.0  ;;  %2483 = vmatprep.subr.msk.mxu0 %vm134_vm0, %v2172_v25  ;;  %v1012_v26 = vld [vmem:[%s3228_s3] sm:$0xff]  ;;  %v1013_v27 = vld [vmem:[%s3228_s3 + $0x8] sm:$0xff] }
  0xfb   :  { %v337_v31 = vmax.f32 %v275_v29, 0.0  ;;  %v2397_v32 = vpop.f32.mrb[16].mxu0  ;;  %2484 = vmatpush3.msk.msra.mxu0 %vm134_vm0, %v2172_v25  ;;  %v2627_v28 = vpack.c.bf16 %v1013_v27, %v1012_v26  ;;  %v2198_v29 = vld [vmem:[%s3229_s4 + $0x18] sm:$0xff] }
  0xfc   :  { %363 = vst.msk [vmem:[#allocation2 + $0x78] sm:$0xff] %vm347_vm4, %v338_v30  ;;  %v290_v33 = vadd.f32 %v2397_v32, %v2906_v38  ;;  %v284_v35 = vpop.f32.mrb[17].mxu0  ;;  %v410_v36 = vld [vmem:[#allocation2 + $0x51] ss:$2 sm:$0xff]  ;;  %v383_v6 = vld [vmem:[#allocation2 + $0x50] ss:$2 sm:$0xff] }
  0xfd   :  { %362 = vst.msk [vmem:[#allocation2 + $0x70] sm:$0xff] %vm347_vm4, %v337_v31  ;;  %v285_v37 = vadd.f32 %v2906_v38, %v284_v35  ;;  %2420 = vmatmul.mubr.msk.f32.gmra.mrb[4].mxu1 %vm347_vm4, %v410_v36  ;;  %v764_v17 = vld [vmem:[#allocation2 + $0x42] ss:$2 sm:$0xff]  ;;  %2628 = vmatprep.subr.bf16.mxu0 %v2627_v28  ;;  %v2723_v31 = vmov 0.0|0.0  }
  0xfe   :  { %v340_v39 = vmax.f32 %v290_v33, 0.0  ;;  %v2199_v30 = vld [vmem:[%s3229_s4 + $0x20] sm:$0xff] }
  0xff   :  { %v339_v40 = vmax.f32 %v285_v37, 0.0  ;;  %v2400_v41 = vpop.f32.mrb[18].mxu0  ;;  %v2636_v32 = vpack.c.bf16 %v2199_v30, %v2198_v29  ;;  %v2169_v33 = vld [vmem:[%s3230_s5 + $0x1] ss:$0 sm:$0xff]  ;;  %v2200_v30 = vld [vmem:[%s3229_s4 + $0x28] sm:$0xf] }
 0x100   :  { %365 = vst.msk [vmem:[#allocation2 + $0x88] sm:$0xff] %vm347_vm4, %v340_v39  ;;  %v300_v42 = vadd.f32 %v2400_v41, %v2906_v38  ;;  %v294_v43 = vpop.f32.mrb[19].mxu0  ;;  %v412_v44 = vld [vmem:[#allocation2 + $0x61] ss:$2 sm:$0xff]  ;;  %v385_v7 = vld [vmem:[#allocation2 + $0x60] ss:$2 sm:$0xff] }
 0x101   :  { %364 = vst.msk [vmem:[#allocation2 + $0x80] sm:$0xff] %vm347_vm4, %v339_v40  ;;  %v295_v45 = vadd.f32 %v2906_v38, %v294_v43  ;;  %2422 = vmatprep.mubr.msk.f32.mxu1 %vm347_vm4, %v412_v44  ;;  %v766_v18 = vld [vmem:[#allocation2 + $0x52] ss:$2 sm:$0xff] }
 0x102   :  { %v342_v46 = vmax.f32 %v300_v42, 0.0 }
 0x103   :  { %v341_v47 = vmax.f32 %v295_v45, 0.0  ;;  %v2403_v48 = vpop.f32.mrb[20].mxu0 }
 0x104   :  { %367 = vst.msk [vmem:[#allocation2 + $0x98] sm:$0xff] %vm347_vm4, %v342_v46  ;;  %v310_v49 = vadd.f32 %v2403_v48, %v2906_v38  ;;  %v304_v50 = vpop.f32.mrb[21].mxu0  ;;  %v414_v51 = vld [vmem:[#allocation2 + $0x71] ss:$2 sm:$0xff]  ;;  %v387_v8 = vld [vmem:[#allocation2 + $0x70] ss:$2 sm:$0xff] }
 0x105   :  { %366 = vst.msk [vmem:[#allocation2 + $0x90] sm:$0xff] %vm347_vm4, %v341_v47  ;;  %v305_v52 = vadd.f32 %v2906_v38, %v304_v50  ;;  %2423 = vmatmul.mubr.msk.f32.gmra.mrb[6].mxu1 %vm347_vm4, %v414_v51  ;;  %v768_v19 = vld [vmem:[#allocation2 + $0x62] ss:$2 sm:$0xff] }
 0x106   :  { %v344_v53 = vmax.f32 %v310_v49, 0.0 }
 0x107   :  { %v343_v54 = vmax.f32 %v305_v52, 0.0  ;;  %v2406_v55 = vpop.f32.mrb[22].mxu0 }
 0x108   :  { %369 = vst.msk [vmem:[#allocation2 + $0xa8] sm:$0xff] %vm347_vm4, %v344_v53  ;;  %v320_v56 = vadd.f32 %v2406_v55, %v2906_v38  ;;  %v314_v57 = vpop.f32.mrb[23].mxu0  ;;  %v416_v58 = vld [vmem:[#allocation2 + $0x81] ss:$2 sm:$0xff]  ;;  %v389_v9 = vld [vmem:[#allocation2 + $0x80] ss:$2 sm:$0xff] }
 0x109   :  { %368 = vst.msk [vmem:[#allocation2 + $0xa0] sm:$0xff] %vm347_vm4, %v343_v54  ;;  %v315_v59 = vadd.f32 %v2906_v38, %v314_v57  ;;  %2425 = vmatprep.mubr.msk.f32.mxu1 %vm347_vm4, %v416_v58  ;;  %v375_v38 = vld [vmem:[#allocation2 + $0x10] ss:$2 sm:$0xff] }
 0x10a   :  { %v346_v60 = vmax.f32 %v320_v56, 0.0  ;;  %v770_v20 = vld [vmem:[#allocation2 + $0x72] ss:$2 sm:$0xff] }
 0x10b   :  { %v345_v61 = vmax.f32 %v315_v59, 0.0 }
 0x10c   :  { %371 = vst.msk [vmem:[#allocation2 + $0xb8] sm:$0xff] %vm347_vm4, %v346_v60  ;;  %v418_v62 = vld [vmem:[#allocation2 + $0x91] ss:$2 sm:$0xff]  ;;  %v391_v10 = vld [vmem:[#allocation2 + $0x90] ss:$2 sm:$0xff] }
 0x10d   :  { %370 = vst.msk [vmem:[#allocation2 + $0xb0] sm:$0xff] %vm347_vm4, %v345_v61  ;;  %2426 = vmatmul.mubr.msk.f32.gmra.mrb[8].mxu1 %vm347_vm4, %v418_v62  ;;  %v772_v21 = vld [vmem:[#allocation2 + $0x82] ss:$2 sm:$0xff] }
 0x10e   :  { %v1014_v62 = vld [vmem:[%s3228_s3 + $0x10] sm:$0xf] }
 0x110   :  { %v420_v63 = vld [vmem:[#allocation2 + $0xa1] ss:$2 sm:$0xff]  ;;  %v774_v22 = vld [vmem:[#allocation2 + $0x92] ss:$2 sm:$0xff] }
 0x111   :  { %2428 = vmatprep.mubr.msk.f32.mxu1 %vm347_vm4, %v420_v63 }
 0x114   :  { %v422_v0 = vld [vmem:[#allocation2 + $0xb1] ss:$2 sm:$0xff]  ;;  %v395_v12 = vld [vmem:[#allocation2 + $0xb0] ss:$2 sm:$0xff] }
 0x115   :  { %2429 = vmatmul.mubr.msk.f32.gmra.mrb[10].mxu1 %vm347_vm4, %v422_v0  ;;  %v776_v23 = vld [vmem:[#allocation2 + $0xa2] ss:$2 sm:$0xff]  ;;  %v778_v24 = vld [vmem:[#allocation2 + $0xb2] ss:$2 sm:$0xff] }
 0x116   :  { %2437 = vmatprep.mubr.msk.f32.mxu1 %vm347_vm4, %v373_v1 }
 0x119   :  { %2438 = vmatmul.mubr.msk.f32.vlgmr.msra.gmra.mrb[0].mxu1 %vm347_vm4, %v375_v38  ;;  %v2187_v38 = vld [vmem:[%s3228_s3 + $0x30] sm:$0xff] }
 0x11a   :  { %2440 = vmatprep.mubr.msk.f32.mxu1 %vm347_vm4, %v377_v3  ;;  %2622 = vmatpush3.bf16.msra.mxu1 %v2938_v11  ;;  %v393_v11 = vld [vmem:[#allocation2 + $0xa0] ss:$2 sm:$0xff] }
 0x11b   :  { %2459 = vmatprep.subr.msk.mxu1 %vm134_vm0, %v2155_v2 }
 0x11d   :  { %2441 = vmatmul.mubr.msk.f32.gmra.mrb[2].mxu1 %vm347_vm4, %v379_v4 }
 0x11e   :  { %2443 = vmatprep.mubr.msk.f32.mxu1 %vm347_vm4, %v381_v5  ;;  %2460 = vmatpush3.msk.msra.mxu1 %vm134_vm0, %v2155_v2  ;;  %v2188_v2 = vld [vmem:[%s3228_s3 + $0x38] sm:$0xff] }
 0x11f   :  { %2635 = vmatprep.subr.bf16.mxu1 %v2723_v31 }
 0x121   :  { %2444 = vmatmul.mubr.msk.f32.gmra.mrb[4].mxu1 %vm347_vm4, %v383_v6 }
 0x122   :  { %2446 = vmatprep.mubr.msk.f32.mxu1 %vm347_vm4, %v385_v7  ;;  %v2631_v7 = vpack.c.bf16 %v2188_v2, %v2187_v38 }
 0x125   :  { %2447 = vmatmul.mubr.msk.f32.gmra.mrb[6].mxu1 %vm347_vm4, %v387_v8 }
 0x126   :  { %2449 = vmatprep.mubr.msk.f32.mxu1 %vm347_vm4, %v389_v9 }
 0x129   :  { %2450 = vmatmul.mubr.msk.f32.gmra.mrb[8].mxu1 %vm347_vm4, %v391_v10 }
 0x12a   :  { %2452 = vmatprep.mubr.msk.f32.mxu1 %vm347_vm4, %v393_v11 }
 0x12d   :  { %2453 = vmatmul.mubr.msk.f32.gmra.mrb[10].mxu1 %vm347_vm4, %v395_v12 }
 0x12e   :  { %2461 = vmatprep.mubr.msk.f32.mxu1 %vm347_vm4, %v756_v13 }
 0x131   :  { %2462 = vmatmul.mubr.msk.f32.vlgmr.msra.gmra.mrb[0].mxu1 %vm347_vm4, %v758_v14 }
 0x132   :  { %2464 = vmatprep.mubr.msk.f32.mxu1 %vm347_vm4, %v760_v15  ;;  %2637 = vmatpush3.bf16.msra.mxu1 %v2636_v32  ;;  %v1430_v32 = vld [vmem:[%s3229_s4] sm:$0xff] }
 0x133   :  { %2528 = vmatprep.subr.mxu1 %v2722_v34 }
 0x135   :  { %2465 = vmatmul.mubr.msk.f32.gmra.mrb[2].mxu1 %vm347_vm4, %v762_v16 }
 0x136   :  { %2467 = vmatprep.mubr.msk.f32.mxu1 %vm347_vm4, %v764_v17  ;;  %2529 = vmatpush3.msk.msra.mxu1 %vm134_vm0, %v2200_v30 }
 0x137   :  { %2641 = vmatprep.subr.bf16.mxu1 %v2723_v31 }
 0x139   :  { %2468 = vmatmul.mubr.msk.f32.gmra.mrb[4].mxu1 %vm347_vm4, %v766_v18 }
 0x13a   :  { %2470 = vmatprep.mubr.msk.f32.mxu1 %vm347_vm4, %v768_v19  ;;  %v2189_v19 = vld [vmem:[%s3228_s3 + $0x40] sm:$0xf] }
 0x13d   :  { %2471 = vmatmul.mubr.msk.f32.gmra.mrb[6].mxu1 %vm347_vm4, %v770_v20 }
 0x13e   :  { %2473 = vmatprep.mubr.msk.f32.mxu1 %vm347_vm4, %v772_v21 }
 0x141   :  { %2474 = vmatmul.mubr.msk.f32.gmra.mrb[8].mxu1 %vm347_vm4, %v774_v22 }
 0x142   :  { %2476 = vmatprep.mubr.msk.f32.mxu1 %vm347_vm4, %v776_v23 }
 0x145   :  { %2477 = vmatmul.mubr.msk.f32.gmra.mrb[10].mxu1 %vm347_vm4, %v778_v24 }
 0x146   :  { %2530 = vmatprep.mubr.msk.f32.mxu1 %vm2724_vm5, %v2722_v34 }
 0x204   :  { %v2463_v35 = vpop.f32.mrb[0].mxu1 }
 0x205   :  { %v965_v36 = vadd.f32 %v2463_v35, %v2169_v33  ;;  %v888_v37 = vpop.f32.mrb[1].mxu1 }
 0x206   :  { %v964_v39 = vadd.f32 %v2169_v33, %v888_v37  ;;  %v2197_v37 = vld [vmem:[%s3230_s5 + $0x2] ss:$0 sm:$0xff] }
 0x207   :  { %v977_v40 = vmax.f32 %v965_v36, 0.0  ;;  %v1432_v36 = vld [vmem:[%s3229_s4 + $0x10] sm:$0xf] }
 0x208   :  { %v976_v41 = vmax.f32 %v964_v39, 0.0  ;;  %v2466_v42 = vpop.f32.mrb[2].mxu1 }
 0x209   :  { %989 = vst.msk [vmem:[#allocation3 + $0x8] sm:$0xff] %vm347_vm4, %v977_v40  ;;  %v967_v43 = vadd.f32 %v2466_v42, %v2169_v33  ;;  %v898_v44 = vpop.f32.mrb[3].mxu1 }
 0x20a   :  { %988 = vst.msk [vmem:[#allocation3] sm:$0xff] %vm347_vm4, %v976_v41  ;;  %v966_v45 = vadd.f32 %v2169_v33, %v898_v44 }
 0x20b   :  { %v979_v46 = vmax.f32 %v967_v43, 0.0 }
 0x20c   :  { %v978_v47 = vmax.f32 %v966_v45, 0.0  ;;  %v2469_v48 = vpop.f32.mrb[4].mxu1 }
 0x20d   :  { %991 = vst.msk [vmem:[#allocation3 + $0x18] sm:$0xff] %vm347_vm4, %v979_v46  ;;  %v969_v49 = vadd.f32 %v2469_v48, %v2169_v33  ;;  %v908_v50 = vpop.f32.mrb[5].mxu1 }
 0x20e   :  { %990 = vst.msk [vmem:[#allocation3 + $0x10] sm:$0xff] %vm347_vm4, %v978_v47  ;;  %v968_v51 = vadd.f32 %v2169_v33, %v908_v50 }
 0x20f   :  { %v981_v52 = vmax.f32 %v969_v49, 0.0 }
 0x210   :  { %v980_v53 = vmax.f32 %v968_v51, 0.0  ;;  %v2472_v54 = vpop.f32.mrb[6].mxu1 }
 0x211   :  { %993 = vst.msk [vmem:[#allocation3 + $0x28] sm:$0xff] %vm347_vm4, %v981_v52  ;;  %v971_v55 = vadd.f32 %v2472_v54, %v2169_v33  ;;  %v918_v56 = vpop.f32.mrb[7].mxu1  ;;  %v1016_v57 = vld [vmem:[#allocation3 + $0x1] ss:$2 sm:$0xff]  ;;  %v1001_v17 = vld [vmem:[#allocation3] ss:$2 sm:$0xff] }
 0x212   :  { %992 = vst.msk [vmem:[#allocation3 + $0x20] sm:$0xff] %vm347_vm4, %v980_v53  ;;  %v970_v58 = vadd.f32 %v2169_v33, %v918_v56  ;;  %2485 = vmatprep.mubr.msk.f32.mxu0 %vm347_vm4, %v1016_v57  ;;  %v2209_v52 = vld [vmem:[%s3229_s4 + $0x30] sm:$0xff]  ;;  %v2210_v53 = vld [vmem:[%s3229_s4 + $0x38] sm:$0xff] }
 0x213   :  { %v983_v59 = vmax.f32 %v971_v55, 0.0 }
 0x214   :  { %v982_v60 = vmax.f32 %v970_v58, 0.0  ;;  %v2475_v61 = vpop.f32.mrb[8].mxu1  ;;  %v2642_v58 = vpack.c.bf16 %v2210_v53, %v2209_v52 }
 0x215   :  { %995 = vst.msk [vmem:[#allocation3 + $0x38] sm:$0xff] %vm347_vm4, %v983_v59  ;;  %v973_v63 = vadd.f32 %v2475_v61, %v2169_v33  ;;  %v928_v0 = vpop.f32.mrb[9].mxu1  ;;  %v1018_v1 = vld [vmem:[#allocation3 + $0x11] ss:$2 sm:$0xff]  ;;  %v1003_v18 = vld [vmem:[#allocation3 + $0x10] ss:$2 sm:$0xff] }
 0x216   :  { %994 = vst.msk [vmem:[#allocation3 + $0x30] sm:$0xff] %vm347_vm4, %v982_v60  ;;  %v972_v3 = vadd.f32 %v2169_v33, %v928_v0  ;;  %2486 = vmatmul.mubr.msk.f32.vlgmr.msra.gmra.mrb[24].mxu0 %vm347_vm4, %v1018_v1  ;;  %v1264_v24 = vld [vmem:[#allocation3 + $0x2] ss:$2 sm:$0xff]  ;;  %v2211_v0 = vld [vmem:[%s3229_s4 + $0x40] sm:$0xf] }
 0x217   :  { %v985_v4 = vmax.f32 %v973_v63, 0.0  ;;  %2630 = vmatpush3.bf16.msra.mxu0 %v2627_v28 }
 0x218   :  { %v984_v5 = vmax.f32 %v972_v3, 0.0  ;;  %v2478_v6 = vpop.f32.mrb[10].mxu1  ;;  %2498 = vmatprep.subr.msk.mxu0 %vm134_vm0, %v1014_v62 }
 0x219   :  { %997 = vst.msk [vmem:[#allocation3 + $0x48] sm:$0xff] %vm347_vm4, %v985_v4  ;;  %v975_v8 = vadd.f32 %v2478_v6, %v2169_v33  ;;  %v938_v9 = vpop.f32.mrb[11].mxu1  ;;  %v1020_v10 = vld [vmem:[#allocation3 + $0x21] ss:$2 sm:$0xff]  ;;  %v1005_v20 = vld [vmem:[#allocation3 + $0x20] ss:$2 sm:$0xff] }
 0x21a   :  { %996 = vst.msk [vmem:[#allocation3 + $0x40] sm:$0xff] %vm347_vm4, %v984_v5  ;;  %v974_v11 = vadd.f32 %v2169_v33, %v938_v9  ;;  %2488 = vmatprep.mubr.msk.f32.mxu0 %vm347_vm4, %v1020_v10  ;;  %v1266_v25 = vld [vmem:[#allocation3 + $0x12] ss:$2 sm:$0xff] }
 0x21b   :  { %v987_v12 = vmax.f32 %v975_v8, 0.0  ;;  %2499 = vmatpush3.msk.msra.mxu0 %vm134_vm0, %v1014_v62  ;;  %v1431_v33 = vld [vmem:[%s3229_s4 + $0x8] sm:$0xff]  ;;  %v2217_v5 = vld [vmem:[%s3231_s6 + $0x18] sm:$0xff]  ;;  %v2218_v6 = vld [vmem:[%s3231_s6 + $0x20] sm:$0xff]  ;;  %s2090_s4 = sshll.u32 %s2725_s17, 4  ;;  %s2091_s4 = int_to_ptr.vmem [resolvable:$true] %s2090_s4 }
 0x21c   :  { %v986_v13 = vmax.f32 %v974_v11, 0.0  ;;  %2632 = vmatprep.subr.bf16.mxu0 %v2631_v7  ;;  %v2639_v35 = vpack.c.bf16 %v1431_v33, %v1430_v32  ;;  %v2645_v8 = vpack.c.bf16 %v2218_v6, %v2217_v5  ;;  %v1748_v9 = vld [vmem:[%s3231_s6 + $0x8] sm:$0xff]  ;;  %s2697_s18 = scalar_lea.vmem %s2091_s4, 64  ;;  %p2702_p1 = scmp.lt.s32.totalorder %s2091_s4, %s2091_s4 }
 0x21d   :  { %999 = vst.msk [vmem:[#allocation3 + $0x58] sm:$0xff] %vm347_vm4, %v987_v12  ;;  %v1022_v14 = vld [vmem:[#allocation3 + $0x31] ss:$2 sm:$0xff]  ;;  %v1007_v21 = vld [vmem:[#allocation3 + $0x30] ss:$2 sm:$0xff]  ;;  %p2698_p0 = scmp.ne.s32.totalorder %s2091_s4, %s2697_s18  ;;  %p2703_p2 = scmp.lt.s32.totalorder %s2697_s18, %s2697_s18 }
 0x21e   :  { %998 = vst.msk [vmem:[#allocation3 + $0x50] sm:$0xff] %vm347_vm4, %v986_v13  ;;  %2489 = vmatmul.mubr.msk.f32.gmra.mrb[26].mxu0 %vm347_vm4, %v1022_v14  ;;  %v1268_v26 = vld [vmem:[#allocation3 + $0x22] ss:$2 sm:$0xff] }
 0x21f   :  { %v2219_v11 = vld [vmem:[%s3231_s6 + $0x28] sm:$0xf]  ;;  %v1749_v12 = vld [vmem:[%s3231_s6 + $0x10] sm:$0xf]  ;;  %p2704_p3 = por %p2703_p2, %p2702_p1 }
 0x221   :  { %v1024_v15 = vld [vmem:[#allocation3 + $0x41] ss:$2 sm:$0xff]  ;;  %v1009_v22 = vld [vmem:[#allocation3 + $0x40] ss:$2 sm:$0xff]  ;;  %p2705_p4 = pnand %p2704_p3, %p2698_p0 }
 0x222   :  { %2491 = vmatprep.mubr.msk.f32.mxu0 %vm347_vm4, %v1024_v15  ;;  %v1270_v27 = vld [vmem:[#allocation3 + $0x32] ss:$2 sm:$0xff] }
 0x225   :  { %v1026_v16 = vld [vmem:[#allocation3 + $0x51] ss:$2 sm:$0xff]  ;;  %v1011_v23 = vld [vmem:[#allocation3 + $0x50] ss:$2 sm:$0xff] }
 0x226   :  { %2492 = vmatmul.mubr.msk.f32.gmra.mrb[28].mxu0 %vm347_vm4, %v1026_v16  ;;  %v1272_v28 = vld [vmem:[#allocation3 + $0x42] ss:$2 sm:$0xff]  ;;  %v1274_v29 = vld [vmem:[#allocation3 + $0x52] ss:$2 sm:$0xff] }
 0x227   :  { %2500 = vmatprep.mubr.msk.f32.mxu0 %vm347_vm4, %v1001_v17 }
 0x22a   :  { %2501 = vmatmul.mubr.msk.f32.vlgmr.msra.gmra.mrb[24].mxu0 %vm347_vm4, %v1003_v18 }
 0x22b   :  { %2503 = vmatprep.mubr.msk.f32.mxu0 %vm347_vm4, %v1005_v20  ;;  %2634 = vmatpush3.bf16.msra.mxu0 %v2631_v7  ;;  %v1747_v7 = vld [vmem:[%s3231_s6] sm:$0xff] }
 0x22c   :  { %2513 = vmatprep.subr.msk.mxu0 %vm134_vm0, %v2189_v19  ;;  %v2648_v10 = vpack.c.bf16 %v1748_v9, %v1747_v7 }
 0x22e   :  { %2504 = vmatmul.mubr.msk.f32.gmra.mrb[26].mxu0 %vm347_vm4, %v1007_v21 }
 0x22f   :  { %2506 = vmatprep.mubr.msk.f32.mxu0 %vm347_vm4, %v1009_v22  ;;  %2514 = vmatpush3.msk.msra.mxu0 %vm134_vm0, %v2189_v19 }
 0x230   :  { %2638 = vmatprep.subr.bf16.mxu0 %v2723_v31 }
 0x232   :  { %2507 = vmatmul.mubr.msk.f32.gmra.mrb[28].mxu0 %vm347_vm4, %v1011_v23 }
 0x233   :  { %2515 = vmatprep.mubr.msk.f32.mxu0 %vm347_vm4, %v1264_v24 }
 0x236   :  { %2516 = vmatmul.mubr.msk.f32.vlgmr.msra.gmra.mrb[24].mxu0 %vm347_vm4, %v1266_v25 }
 0x237   :  { %2518 = vmatprep.mubr.msk.f32.mxu0 %vm347_vm4, %v1268_v26  ;;  %2640 = vmatpush3.bf16.msra.mxu0 %v2639_v35 }
 0x238   :  { %2543 = vmatprep.subr.mxu0 %v2722_v34 }
 0x23a   :  { %2519 = vmatmul.mubr.msk.f32.gmra.mrb[26].mxu0 %vm347_vm4, %v1270_v27 }
 0x23b   :  { %2521 = vmatprep.mubr.msk.f32.mxu0 %vm347_vm4, %v1272_v28  ;;  %2544 = vmatpush3.msk.msra.mxu0 %vm134_vm0, %v1432_v36 }
 0x23c   :  { %2644 = vmatprep.subr.bf16.mxu0 %v2723_v31 }
 0x23e   :  { %2522 = vmatmul.mubr.msk.f32.gmra.mrb[28].mxu0 %vm347_vm4, %v1274_v29 }
 0x23f   :  { %2545 = vmatprep.mubr.msk.f32.mxu0 %vm2724_vm5, %v2722_v34 }
 0x309   :  { %v2517_v39 = vpop.f32.mrb[24].mxu0 }
 0x30a   :  { %v1407_v40 = vadd.f32 %v2517_v39, %v2197_v37  ;;  %v1366_v41 = vpop.f32.mrb[25].mxu0 }
 0x30b   :  { %v1406_v42 = vadd.f32 %v2197_v37, %v1366_v41 }
 0x30c   :  { %v1413_v43 = vmax.f32 %v1407_v40, 0.0 }
 0x30d   :  { %v1412_v44 = vmax.f32 %v1406_v42, 0.0  ;;  %v2520_v45 = vpop.f32.mrb[26].mxu0 }
 0x30e   :  { %1419 = vst.msk [vmem:[#allocation4 + $0x8] sm:$0xff] %vm347_vm4, %v1413_v43  ;;  %v1409_v46 = vadd.f32 %v2520_v45, %v2197_v37  ;;  %v1376_v47 = vpop.f32.mrb[27].mxu0 }
 0x30f   :  { %1418 = vst.msk [vmem:[#allocation4] sm:$0xff] %vm347_vm4, %v1412_v44  ;;  %v1408_v48 = vadd.f32 %v2197_v37, %v1376_v47  ;;  %v2225_v47 = vld [vmem:[%s3231_s6 + $0x38] sm:$0xff] }
 0x310   :  { %v1415_v49 = vmax.f32 %v1409_v46, 0.0  ;;  %v2224_v46 = vld [vmem:[%s3231_s6 + $0x30] sm:$0xff] }
 0x311   :  { %v1414_v50 = vmax.f32 %v1408_v48, 0.0  ;;  %v2523_v51 = vpop.f32.mrb[28].mxu0  ;;  %v2229_v48 = vld [vmem:[%s3231_s6 + $0x48] sm:$0xff] }
 0x312   :  { %1421 = vst.msk [vmem:[#allocation4 + $0x18] sm:$0xff] %vm347_vm4, %v1415_v49  ;;  %v1411_v54 = vadd.f32 %v2523_v51, %v2197_v37  ;;  %v1386_v55 = vpop.f32.mrb[29].mxu0  ;;  %v2230_v49 = vld [vmem:[%s3231_s6 + $0x50] sm:$0xff] }
 0x313   :  { %1420 = vst.msk [vmem:[#allocation4 + $0x10] sm:$0xff] %vm347_vm4, %v1414_v50  ;;  %v1410_v56 = vadd.f32 %v2197_v37, %v1386_v55  ;;  %v2651_v50 = vpack.c.bf16 %v2225_v47, %v2224_v46  ;;  %v2654_v51 = vpack.c.bf16 %v2230_v49, %v2229_v48  ;;  %v2231_v55 = vld [vmem:[%s3231_s6 + $0x58] sm:$0xf] }
 0x314   :  { %v1417_v57 = vmax.f32 %v1411_v54, 0.0  ;;  %v2226_v54 = vld [vmem:[%s3231_s6 + $0x40] sm:$0xf] }
 0x315   :  { %v1416_v59 = vmax.f32 %v1410_v56, 0.0 }
 0x316   :  { %1423 = vst.msk [vmem:[#allocation4 + $0x28] sm:$0xff] %vm347_vm4, %v1417_v57  ;;  %v1434_v60 = vld [vmem:[#allocation4 + $0x1] ss:$2 sm:$0xff]  ;;  %v1425_v61 = vld [vmem:[#allocation4] ss:$2 sm:$0xff] }
 0x317   :  { %1422 = vst.msk [vmem:[#allocation4 + $0x20] sm:$0xff] %vm347_vm4, %v1416_v59  ;;  %2531 = vmatmul.mubr.msk.f32.vlgmr.msra.gmra.mrb[12].mxu1 %vm347_vm4, %v1434_v60  ;;  %2546 = vmatmul.mubr.msk.f32.vlgmr.msra.gmra.mrb[30].mxu0 %vm347_vm4, %v1425_v61 }
 0x318   :  { %2643 = vmatpush3.bf16.msra.mxu1 %v2642_v58  ;;  %2533 = vmatprep.mubr.msk.f32.mxu1 %vm2724_vm5, %v2722_v34 }
 0x319   :  { %2548 = vmatprep.mubr.msk.f32.mxu0 %vm2724_vm5, %v2722_v34  ;;  %2558 = vmatprep.subr.mxu1 %v2722_v34 }
 0x31a   :  { %v1436_v62 = vld [vmem:[#allocation4 + $0x11] ss:$2 sm:$0xff]  ;;  %v1427_v63 = vld [vmem:[#allocation4 + $0x10] ss:$2 sm:$0xff]  ;;  %2646 = vmatpush3.bf16.msra.mxu0 %v2645_v8 }
 0x31b   :  { %2534 = vmatmul.mubr.msk.f32.gmra.mrb[14].mxu1 %vm347_vm4, %v1436_v62  ;;  %2549 = vmatmul.mubr.msk.f32.gmra.mrb[32].mxu0 %vm347_vm4, %v1427_v63  ;;  %v1628_v2 = vld [vmem:[#allocation4 + $0x2] ss:$2 sm:$0xff] }
 0x31c   :  { %2536 = vmatprep.mubr.msk.f32.mxu1 %vm2724_vm5, %v2722_v34  ;;  %2551 = vmatprep.mubr.msk.f32.mxu0 %vm2724_vm5, %v2722_v34 }
 0x31d   :  { %2559 = vmatpush3.msk.msra.mxu1 %vm134_vm0, %v2211_v0  ;;  %2573 = vmatprep.subr.mxu0 %v2722_v34 }
 0x31e   :  { %v1438_v1 = vld [vmem:[#allocation4 + $0x21] ss:$2 sm:$0xff]  ;;  %v1429_v38 = vld [vmem:[#allocation4 + $0x20] ss:$2 sm:$0xff]  ;;  %2647 = vmatprep.subr.bf16.mxu1 %v2723_v31  ;;  %2574 = vmatpush3.msk.msra.mxu0 %vm134_vm0, %v2219_v11 }
 0x31f   :  { %2537 = vmatmul.mubr.msk.f32.gmra.mrb[16].mxu1 %vm347_vm4, %v1438_v1  ;;  %2552 = vmatmul.mubr.msk.f32.gmra.mrb[34].mxu0 %vm347_vm4, %v1429_v38  ;;  %v1630_v3 = vld [vmem:[#allocation4 + $0x12] ss:$2 sm:$0xff]  ;;  %v1632_v4 = vld [vmem:[#allocation4 + $0x22] ss:$2 sm:$0xff] }
 0x320   :  { %2560 = vmatprep.mubr.msk.f32.mxu1 %vm2724_vm5, %v2722_v34  ;;  %2575 = vmatprep.mubr.msk.f32.mxu0 %vm2724_vm5, %v2722_v34 }
 0x321   :  { %2650 = vmatprep.subr.bf16.mxu0 %v2723_v31 }
 0x323   :  { %2561 = vmatmul.mubr.msk.f32.vlgmr.msra.gmra.mrb[18].mxu1 %vm347_vm4, %v1628_v2  ;;  %v2234_v2 = vld [vmem:[%s3232_s7] ss:$0 sm:$0xff] }
 0x324   :  { %2563 = vmatprep.mubr.msk.f32.mxu1 %vm2724_vm5, %v2722_v34  ;;  %2649 = vmatpush3.bf16.msra.mxu1 %v2648_v10 }
 0x325   :  { %2582 = vmatprep.subr.mxu1 %v2722_v34 }
 0x327   :  { %2564 = vmatmul.mubr.msk.f32.gmra.mrb[20].mxu1 %vm347_vm4, %v1630_v3 }
 0x328   :  { %2566 = vmatprep.mubr.msk.f32.mxu1 %vm2724_vm5, %v2722_v34  ;;  %2583 = vmatpush3.msk.msra.mxu1 %vm134_vm0, %v1749_v12 }
 0x329   :  { %2653 = vmatprep.subr.bf16.mxu1 %v2723_v31  ;;  %v2216_v31 = vld [vmem:[%s3230_s5 + $0x3] ss:$0 sm:$0xff] }
 0x32b   :  { %2567 = vmatmul.mubr.msk.f32.gmra.mrb[22].mxu1 %vm347_vm4, %v1632_v4 }
 0x32c   :  { %2584 = vmatprep.mubr.msk.f32.mxu1 %vm2724_vm5, %v2722_v34 }
 0x3ea   :  { %v1521_v13 = vpop.f32.mrb[12].mxu1  ;;  %v1613_v14 = vpop.f32.mrb[30].mxu0 }
 0x3eb   :  { %v1614_v15 = vadd.f32 %v1613_v14, %v1521_v13  ;;  %v2532_v16 = vpop.f32.mrb[13].mxu1  ;;  %v2547_v17 = vpop.f32.mrb[31].mxu0 }
 0x3ee   :  { %v1526_v18 = vpop.f32.mrb[14].mxu1  ;;  %v1618_v19 = vpop.f32.mrb[32].mxu0 }
 0x3ef   :  { %v1619_v20 = vadd.f32 %v1618_v19, %v1526_v18  ;;  %v2535_v21 = vpop.f32.mrb[15].mxu1  ;;  %v2550_v22 = vpop.f32.mrb[33].mxu0 }
 0x3f2   :  { %v1531_v23 = vpop.f32.mrb[16].mxu1  ;;  %v1623_v24 = vpop.f32.mrb[34].mxu0 }
 0x3f3   :  { %v1624_v25 = vadd.f32 %v1623_v24, %v1531_v23  ;;  %v2538_v26 = vpop.f32.mrb[17].mxu1  ;;  %v2553_v27 = vpop.f32.mrb[35].mxu0 }
 0x3f6   :  { %v1715_v28 = vpop.f32.mrb[18].mxu1 }
 0x3f7   :  { %v1729_v29 = vadd.f32 %v1715_v28, %v1614_v15  ;;  %v2562_v30 = vpop.f32.mrb[19].mxu1 }
 0x3f9   :  { %v1737_v32 = vadd.f32 %v2216_v31, %v1729_v29 }
 0x3fa   :  { %v1720_v33 = vpop.f32.mrb[20].mxu1 }
 0x3fb   :  { %v1740_v35 = vmax.f32 %v1737_v32, 0.0  ;;  %v1730_v36 = vadd.f32 %v1720_v33, %v1619_v20  ;;  %v2565_v37 = vpop.f32.mrb[21].mxu1 }
 0x3fd   :  { %1743 = vst.msk [vmem:[#allocation5] sm:$0xff] %vm347_vm4, %v1740_v35  ;;  %v1738_v39 = vadd.f32 %v2216_v31, %v1730_v36 }
 0x3fe   :  { %v1725_v40 = vpop.f32.mrb[22].mxu1 }
 0x3ff   :  { %v1741_v41 = vmax.f32 %v1738_v39, 0.0  ;;  %v1731_v42 = vadd.f32 %v1725_v40, %v1624_v25  ;;  %v2568_v43 = vpop.f32.mrb[23].mxu1 }
 0x401   :  { %1744 = vst.msk [vmem:[#allocation5 + $0x8] sm:$0xff] %vm347_vm4, %v1741_v41  ;;  %v1739_v44 = vadd.f32 %v2216_v31, %v1731_v42 }
 0x403   :  { %v1742_v45 = vmax.f32 %v1739_v44, 0.0 }
 0x405   :  { %1745 = vst.msk [vmem:[#allocation5 + $0x10] sm:$0xff] %vm347_vm4, %v1742_v45 }
 0x40c   :  { %v1751_v52 = vld [vmem:[#allocation5 + $0x1] ss:$6 sm:$0xf]  ;;  %v1746_v53 = vld [vmem:[#allocation5] ss:$6 sm:$0xf] }
 0x40d   :  { %2576 = vmatmul.mubr.msk.f32.vlgmr.msra.gmra.mrb[36].mxu0 %vm347_vm4, %v1751_v52  ;;  %2585 = vmatmul.mubr.msk.f32.vlgmr.msra.gmra.mrb[24].mxu1 %vm347_vm4, %v1746_v53  ;;  %v1909_v56 = vld [vmem:[#allocation5 + $0x2] ss:$6 sm:$0xf]  ;;  %v1992_v57 = vld [vmem:[#allocation5 + $0x3] ss:$6 sm:$0xf] }
 0x40e   :  { %2652 = vmatpush3.bf16.msra.mxu0 %v2651_v50  ;;  %2655 = vmatpush3.bf16.msra.mxu1 %v2654_v51 }
 0x40f   :  { %2591 = vmatprep.subr.mxu0 %v2722_v34  ;;  %2600 = vmatprep.subr.mxu1 %v2722_v34 }
 0x410   :  { %2593 = vmatprep.mubr.msk.f32.mxu0 %vm2724_vm5, %v2722_v34  ;;  %2602 = vmatprep.mubr.msk.f32.mxu1 %vm2724_vm5, %v2722_v34 }
 0x412   :  { %2592 = vmatpush3.msk.msra.mxu0 %vm134_vm0, %v2226_v54  ;;  %2601 = vmatpush3.msk.msra.mxu1 %vm134_vm0, %v2231_v55 }
 0x413   :  { %2594 = vmatmul.mubr.msk.f32.vlgmr.msra.gmra.mrb[38].mxu0 %vm347_vm4, %v1909_v56  ;;  %2603 = vmatmul.mubr.msk.f32.vlgmr.msra.gmra.mrb[26].mxu1 %vm347_vm4, %v1992_v57 }
 0x4e0   :  { %v1828_v58 = vpop.f32.mrb[36].mxu0  ;;  %v1904_v59 = vpop.f32.mrb[24].mxu1 }
 0x4e1   :  { %v1905_v60 = vadd.f32 %v1904_v59, %v1828_v58  ;;  %v2577_v61 = vpop.f32.mrb[37].mxu0  ;;  %v2586_v62 = vpop.f32.mrb[25].mxu1 }
 0x4e6   :  { %v1986_v63 = vpop.f32.mrb[38].mxu0  ;;  %v2069_v0 = vpop.f32.mrb[26].mxu1 }
 0x4e7   :  { %v1990_v1 = vadd.f32 %v1986_v63, %v1905_v60  ;;  %v2595_v38 = vpop.f32.mrb[39].mxu0  ;;  %v2604_v34 = vpop.f32.mrb[27].mxu1 }
 0x4e9   :  { %v2073_v3 = vadd.f32 %v2069_v0, %v1990_v1 }
 0x4eb   :  { %v2081_v4 = vadd.f32 %v2234_v2, %v2073_v3 }
 0x4ed   :  { %2083 = vst.msk [vmem:[#allocation6] sm:$0xf] %vm2082_vm6, %v2081_v4 }
 0x4ee   :  { %2708 = shalt.err (!%p2705_p4)
}
 0x4ef   :  { %s2709_s21 = scalar_lea.hbm %s3233_s8, 64 }
 0x4f0   :  { %p2710_p5 = scmp.ne.s32.totalorder %s3233_s8, %s2709_s21  ;;  %p2713_p6 = scmp.lt.u32.totalorder %s2709_s21, %s3233_s8 }
 0x4f2   :  { %p2715_p7 = pnand %p2713_p6, %p2710_p5 }
 0x4f4   :  { %2718 = shalt.err (!%p2715_p7)
}
 0x4f5   :  { %2093 = dma.vmem_to_hbm [thread:$0]  %s2091_s4, 64, %s3233_s8, [#allocation7]  }
 0x4f6   :  { %2719 = dma.done.wait [#allocation7], 64  }
 0x4f7   :  { %2720 = vsyncadd [#allocation7], 4294967232 }
 0x4f8   :  { %2097 = vsyncpa [#allocation7], 1 }

</bundles_post_ra>
